<compile_context>
chip_gen: v7x
topology: tpu7x:2x2x1
jax: 0.10.0
libtpu: 0.0.40
codegen_flags: <defaults>
</compile_context>

<pallas_src>
import functools

import jax
import jax.numpy as jnp
from jax.experimental import pallas as pl
from jax.experimental.pallas import tpu as pltpu


# --------------------------------------------------------------------------
# GroupNorm (optionally fused residual add):  out = GN(x [+ res]) * gamma + beta
# --------------------------------------------------------------------------
def _groupnorm_kernel(*refs, eps, has_residual):
    if has_residual:
        x_ref, res_ref, gamma_ref, beta_ref, o_ref = refs
    else:
        x_ref, gamma_ref, beta_ref, o_ref = refs
        res_ref = None
    x = x_ref[...].astype(jnp.float32)                       # (G, Cg, HW)
    if has_residual:
        x = x + res_ref[...].astype(jnp.float32)
    cnt = x.shape[1] * x.shape[2]
    # single-pass exact stats: lane reduce then sublane reduce, one divide
    mean = jnp.sum(jnp.sum(x, axis=2, keepdims=True), axis=1, keepdims=True) / cnt
    d = x - mean
    var = jnp.sum(jnp.sum(d * d, axis=2, keepdims=True), axis=1, keepdims=True) / cnt
    xn = d * jax.lax.rsqrt(var + eps)
    gamma = gamma_ref[...].astype(jnp.float32)               # (G, Cg, 1) lane-broadcast
    beta = beta_ref[...].astype(jnp.float32)
    o_ref[...] = (xn * gamma + beta).astype(o_ref.dtype)


def groupnorm(x, gamma, beta, num_groups, *, residual=None, eps=1e-5):
    B, C, H, W = x.shape
    G = num_groups
    Cg = C // G
    HW = H * W
    xr = x.reshape(B * G, Cg, HW)
    data_spec = pl.BlockSpec((G, Cg, HW), lambda i: (i, 0, 0))
    param_spec = pl.BlockSpec((G, Cg, 1), lambda i: (0, 0, 0))
    args = [xr]
    in_specs = [data_spec]
    if residual is not None:
        args.append(residual.reshape(B * G, Cg, HW))
        in_specs.append(data_spec)
    args += [gamma.reshape(G, Cg, 1), beta.reshape(G, Cg, 1)]
    in_specs += [param_spec, param_spec]
    out = pl.pallas_call(
        functools.partial(_groupnorm_kernel, eps=eps, has_residual=residual is not None),
        out_shape=jax.ShapeDtypeStruct((B * G, Cg, HW), x.dtype),
        grid=(B,),
        in_specs=in_specs,
        out_specs=data_spec,
        compiler_params=pltpu.CompilerParams(dimension_semantics=("parallel",)),
    )(*args)
    return out.reshape(B, C, H, W)


# --------------------------------------------------------------------------
# Linear (1x1 conv):  out = act(x @ w + b) [+ residual]   -- bf16 MXU, f32 accum
# --------------------------------------------------------------------------
def _pick_tm(M):
    # Biggest reasonable tile while keeping >= 2 grid programs (v7x megacore).
    if M >= 1024:
        return 512
    if M >= 256:
        return 128
    if M >= 16:
        return max(8, ((M + 1) // 2) // 8 * 8)
    return M


def _linear_kernel(*refs, activation, has_residual):
    if has_residual:
        x_ref, w_ref, b_ref, r_ref, o_ref = refs
    else:
        x_ref, w_ref, b_ref, o_ref = refs
        r_ref = None
    acc = jnp.dot(x_ref[...].astype(jnp.bfloat16), w_ref[...].astype(jnp.bfloat16),
                  preferred_element_type=jnp.float32)
    acc = acc + b_ref[...].astype(jnp.float32)
    if activation == "silu":
        acc = acc * jax.nn.sigmoid(acc)
    if has_residual:
        acc = acc + r_ref[...].astype(jnp.float32)
    o_ref[...] = acc.astype(o_ref.dtype)


def linear(x, w, b, *, activation=None, residual=None):
    M, K = x.shape
    N = w.shape[1]
    tm = _pick_tm(M)
    Mp = tm * pl.cdiv(M, tm)
    if Mp != M:                                  # pad instead of hard-asserting M % tm
        x = jnp.pad(x, ((0, Mp - M), (0, 0)))
        if residual is not None:
            residual = jnp.pad(residual, ((0, Mp - M), (0, 0)))
    in_specs = [
        pl.BlockSpec((tm, K), lambda i: (i, 0)),
        pl.BlockSpec((K, N), lambda i: (0, 0)),
        pl.BlockSpec((1, N), lambda i: (0, 0)),
    ]
    args = [x, w, b.reshape(1, N)]
    if residual is not None:
        in_specs.append(pl.BlockSpec((tm, N), lambda i: (i, 0)))
        args.append(residual)
    out = pl.pallas_call(
        functools.partial(_linear_kernel, activation=activation,
                          has_residual=residual is not None),
        out_shape=jax.ShapeDtypeStruct((Mp, N), x.dtype),
        grid=(Mp // tm,),
        in_specs=in_specs,
        out_specs=pl.BlockSpec((tm, N), lambda i: (i, 0)),
        compiler_params=pltpu.CompilerParams(dimension_semantics=("parallel",)),
    )(*args)
    return out[:M] if Mp != M else out


# --------------------------------------------------------------------------
# Fused FFN:  out = x + (SiLU(x @ w1 + b1) @ w2 + b2)   -- hidden never hits HBM
# --------------------------------------------------------------------------
def _ffn_kernel(x_ref, w1_ref, b1_ref, w2_ref, b2_ref, o_ref):
    x = x_ref[...].astype(jnp.float32)
    h = jnp.dot(x.astype(jnp.bfloat16), w1_ref[...].astype(jnp.bfloat16),
                preferred_element_type=jnp.float32)
    h = h + b1_ref[...].astype(jnp.float32)
    h = h * jax.nn.sigmoid(h)                                # SiLU in f32
    out = jnp.dot(h.astype(jnp.bfloat16), w2_ref[...].astype(jnp.bfloat16),
                  preferred_element_type=jnp.float32)
    out = out + b2_ref[...].astype(jnp.float32)
    o_ref[...] = (x + out).astype(o_ref.dtype)               # fused final residual


def ffn(x, w1, b1, w2, b2):
    M, C = x.shape
    Ch = w1.shape[1]
    tm = _pick_tm(M)
    Mp = tm * pl.cdiv(M, tm)
    xp = jnp.pad(x, ((0, Mp - M), (0, 0))) if Mp != M else x
    # TODO(synk): at real UNet scales tile N/K of w1/w2 too (v7x 64 MiB VMEM budget)
    out = pl.pallas_call(
        _ffn_kernel,
        out_shape=jax.ShapeDtypeStruct((Mp, C), x.dtype),
        grid=(Mp // tm,),
        in_specs=[
            pl.BlockSpec((tm, C), lambda i: (i, 0)),
            pl.BlockSpec((C, Ch), lambda i: (0, 0)),
            pl.BlockSpec((1, Ch), lambda i: (0, 0)),
            pl.BlockSpec((Ch, C), lambda i: (0, 0)),
            pl.BlockSpec((1, C), lambda i: (0, 0)),
        ],
        out_specs=pl.BlockSpec((tm, C), lambda i: (i, 0)),
        compiler_params=pltpu.CompilerParams(dimension_semantics=("parallel",)),
    )(xp, w1, b1.reshape(1, Ch), w2, b2.reshape(1, C))
    return out[:M] if Mp != M else out


# --------------------------------------------------------------------------
# Multi-head attention core (lane-dense).  nn.MultiheadAttention is seq-first and
# the module feeds it (B, HW, C), so the "sequence" is the image batch L = B (small)
# and there are P = HW*num_heads independent LxL attention problems, each of width
# Dh = C // num_heads.  P lives on the lane axis.
# --------------------------------------------------------------------------
def _attn_kernel(q_ref, k_ref, v_ref, o_ref, *, scale):
    q = q_ref[0].astype(jnp.float32) * scale                 # (L, Dh, tp), f32 VPU math
    k = k_ref[0].astype(jnp.float32)
    v = v_ref[0].astype(jnp.float32)
    # scores[i, j, p] = sum_d q[i, d, p] * k[j, d, p]  (one stacked sublane reduce)
    s = jnp.sum(q[:, None, :, :] * k[None, :, :, :], axis=2)        # (L, L, tp)
    m = jnp.max(s, axis=1, keepdims=True)                           # (L, 1, tp)
    e = jnp.exp(s - m)                                              # EUP
    denom = jnp.sum(e, axis=1)                                      # (L, tp)
    inv = pl.reciprocal(denom, approx=True)                         # EUP slot (~free)
    acc = jnp.sum(e[:, :, None, :] * v[None, :, :, :], axis=1)      # (L, Dh, tp)
    o_ref[...] = (acc * inv[:, None, :]).astype(o_ref.dtype)        # lane-dense store


def _pick_tp(P_pad):
    for cand in (512, 256, 128):
        if P_pad % cand == 0 and P_pad // cand >= 2:
            return cand
    for cand in (512, 256, 128):
        if P_pad % cand == 0:
            return cand
    return 128


def multihead_attention(emb2d, L, N, E, w_in, b_in, w_out, b_out, num_heads):
    nh = num_heads
    Dh = E // nh
    P = N * nh

    qkv = linear(emb2d, w_in.T, b_in)                        # fused QKV in_proj (MXU)
    # layout plumbing: one lane-dense slab (3, L, Dh, P) with p = n*nh + h on lanes
    qkv = qkv.reshape(L, N, 3, nh, Dh)
    qkv = jnp.transpose(qkv, (2, 0, 4, 1, 3)).reshape(3, L, Dh, P)

    P_pad = 128 * pl.cdiv(P, 128)                            # pad lanes, no hard assert
    if P_pad != P:
        qkv = jnp.pad(qkv, ((0, 0), (0, 0), (0, 0), (0, P_pad - P)))
    tp = _pick_tp(P_pad)

    # q/k/v are sliced out of the single qkv buffer via three in_specs (no XLA slices)
    in_specs = [
        pl.BlockSpec((1, L, Dh, tp), lambda i, s=s: (s, 0, 0, i)) for s in range(3)
    ]
    attn = pl.pallas_call(
        functools.partial(_attn_kernel, scale=float(Dh) ** -0.5),
        out_shape=jax.ShapeDtypeStruct((L, Dh, P_pad), emb2d.dtype),
        grid=(P_pad // tp,),
        in_specs=in_specs,
        out_specs=pl.BlockSpec((L, Dh, tp), lambda i: (0, 0, i)),
        compiler_params=pltpu.CompilerParams(dimension_semantics=("parallel",)),
    )(qkv, qkv, qkv)

    if P_pad != P:
        attn = attn[:, :, :P]
    attn = attn.reshape(L, Dh, N, nh)
    att2d = jnp.transpose(attn, (0, 2, 3, 1)).reshape(L * N, E)
    return linear(att2d, w_out.T, b_out)                     # out_proj (MXU)


# --------------------------------------------------------------------------
# Full SelfAttention.forward
# --------------------------------------------------------------------------
def self_attention_forward(x, p, num_groups, num_heads):
    B, C, H, W = x.shape
    HW = H * W

    # x = norm1(x)   (no residual -> no zeros tensor HBM read)
    x1 = groupnorm(x, p["g1"], p["b1"], num_groups)

    # emb_x = x.view(B, C, -1).permute(0, 2, 1)  -> seq-first MHA with L = B, N = HW
    emb2d = jnp.transpose(x1.reshape(B, C, HW), (0, 2, 1)).reshape(B * HW, C)
    att2d = multihead_attention(emb2d, B, HW, C,
                                p["w_in"], p["b_in"], p["w_out"], p["b_out"], num_heads)

    # attn_out.permute(1, 2, 0).contiguous().view(B, C, H, W)  (raw reinterpretation,
    # faithfully mirroring the PyTorch module)
    att_img = jnp.transpose(att2d.reshape(B, HW, C), (1, 2, 0)).reshape(B, C, H, W)

    # x = norm2(attn_out + x)   (residual add fused into the GroupNorm kernel)
    x3 = groupnorm(att_img, p["g2"], p["b2"], num_groups, residual=x1)

    # out = x + ffn(x): conv1x1 -> SiLU -> conv1x1 + residual, one fused kernel
    xf = jnp.transpose(x3, (0, 2, 3, 1)).reshape(B * HW, C)
    out = ffn(xf, p["w1"].T, p["bb1"], p["w2"].T, p["bb2"])
    return jnp.transpose(out.reshape(B, H, W, C), (0, 3, 1, 2))


# --------------------------------------------------------------------------
# Pure-JAX f32 reference (mirrors the PyTorch module exactly) for sanity checking
# --------------------------------------------------------------------------
def _gn_ref(x, gamma, beta, G, eps=1e-5):
    B, C, H, W = x.shape
    xr = x.reshape(B, G, -1)
    m = xr.mean(-1, keepdims=True)
    v = ((xr - m) ** 2).mean(-1, keepdims=True)
    xn = ((xr - m) / jnp.sqrt(v + eps)).reshape(B, C, H, W)
    return xn * gamma[None, :, None, None] + beta[None, :, None, None]


def _mha_ref(emb, w_in, b_in, w_out, b_out, nh):
    L, N, E = emb.shape
    Dh = E // nh
    qkv = emb @ w_in.T + b_in
    q, k, v = jnp.split(qkv, 3, axis=-1)
    q = q.reshape(L, N * nh, Dh).transpose(1, 0, 2) * (Dh ** -0.5)
    k = k.reshape(L, N * nh, Dh).transpose(1, 0, 2)
    v = v.reshape(L, N * nh, Dh).transpose(1, 0, 2)
    a = jax.nn.softmax(jnp.einsum("pld,pmd->plm", q, k), axis=-1)
    o = jnp.einsum("plm,pmd->pld", a, v).transpose(1, 0, 2).reshape(L, N, E)
    return o @ w_out.T + b_out


def reference_forward(x, p, G, nh):
    B, C, H, W = x.shape
    x1 = _gn_ref(x, p["g1"], p["b1"], G)
    emb = jnp.transpose(x1.reshape(B, C, H * W), (0, 2, 1))
    att = _mha_ref(emb, p["w_in"], p["b_in"], p["w_out"], p["b_out"], nh)
    att_img = jnp.transpose(att, (1, 2, 0)).reshape(B, C, H, W)
    x3 = _gn_ref(att_img + x1, p["g2"], p["b2"], G)
    h1 = jnp.einsum("bchw,oc->bohw", x3, p["w1"]) + p["bb1"][None, :, None, None]
    h1 = h1 * jax.nn.sigmoid(h1)
    out = jnp.einsum("bchw,oc->bohw", h1, p["w2"]) + p["bb2"][None, :, None, None]
    return x3 + out


# --------------------------------------------------------------------------
if __name__ == "__main__":
    B, C, H, W = 2, 32, 8, 8
    num_heads = 4
    mlp_ratio = 4
    num_groups = min(C // 4, 32)  # as in the module's __init__

    key = jax.random.PRNGKey(0)
    ks = jax.random.split(key, 13)
    f32 = jnp.float32

    params = {
        "g1": 1.0 + 0.05 * jax.random.normal(ks[0], (C,), f32),
        "b1": 0.05 * jax.random.normal(ks[1], (C,), f32),
        "w_in": 0.1 * jax.random.normal(ks[2], (3 * C, C), f32),
        "b_in": 0.05 * jax.random.normal(ks[3], (3 * C,), f32),
        "w_out": 0.1 * jax.random.normal(ks[4], (C, C), f32),
        "b_out": 0.05 * jax.random.normal(ks[5], (C,), f32),
        "g2": 1.0 + 0.05 * jax.random.normal(ks[6], (C,), f32),
        "b2": 0.05 * jax.random.normal(ks[7], (C,), f32),
        "w1": 0.1 * jax.random.normal(ks[8], (mlp_ratio * C, C), f32),   # conv1x1 C->4C
        "bb1": 0.05 * jax.random.normal(ks[9], (mlp_ratio * C,), f32),
        "w2": 0.1 * jax.random.normal(ks[10], (C, mlp_ratio * C), f32),  # conv1x1 4C->C
        "bb2": 0.05 * jax.random.normal(ks[11], (C,), f32),
    }
    x = jax.random.normal(ks[12], (B, C, H, W), f32)

    fwd = jax.jit(self_attention_forward, static_argnums=(2, 3))
    out = jax.block_until_ready(fwd(x, params, num_groups, num_heads))

    ref = jax.block_until_ready(reference_forward(x, params, num_groups, num_heads))
    max_err = float(jnp.max(jnp.abs(out - ref)))
    assert out.shape == (B, C, H, W)
    # bf16 MXU operands (f32 accumulation) vs the all-f32 reference -> relaxed bound
    assert max_err < 5e-2, f"mismatch vs reference: {max_err}"

    print("KERNEL_OK")
</pallas_src>

<mosaic_0001>
module attributes {stable_mosaic.version = 11 : i64} {
  func.func @_groupnorm_kernel(%arg0: i32, %arg1: memref<8x4x64xf32, #tpu.memory_space<vmem>>, %arg2: memref<8x4x1xf32, #tpu.memory_space<vmem>>, %arg3: memref<8x4x1xf32, #tpu.memory_space<vmem>>, %arg4: memref<8x4x64xf32, #tpu.memory_space<vmem>>) attributes {dimension_semantics = [#tpu.dimension_semantics<parallel>], iteration_bounds = array<i64: 2>, scalar_prefetch = 0 : i64, scratch_operands = 0 : i64, tpu.core_type = #tpu.core_type<tc>, window_params = [{transform_indices = @transform_0, window_bounds = array<i64: 8, 4, 64>}, {pipeline_mode = #tpu.pipeline_mode<synchronous>, transform_indices = @transform_1, window_bounds = array<i64: 8, 4, 1>}, {pipeline_mode = #tpu.pipeline_mode<synchronous>, transform_indices = @transform_2, window_bounds = array<i64: 8, 4, 1>}, {transform_indices = @transform_3, window_bounds = array<i64: 8, 4, 64>}]} {
    %c0 = arith.constant 0 : index
    %c0_0 = arith.constant 0 : index
    %c0_1 = arith.constant 0 : index
    %0 = vector.load %arg1[%c0, %c0_0, %c0_1] : memref<8x4x64xf32, #tpu.memory_space<vmem>>, vector<8x4x64xf32>
    %cst = arith.constant dense<0.000000e+00> : vector<8x4xf32>
    %1 = vector.multi_reduction <add>, %0, %cst [2] : vector<8x4x64xf32> to vector<8x4xf32>
    %2 = vector.shape_cast %1 : vector<8x4xf32> to vector<8x4x1xf32>
    %cst_2 = arith.constant dense<0.000000e+00> : vector<8x1xf32>
    %3 = vector.multi_reduction <add>, %2, %cst_2 [1] : vector<8x4x1xf32> to vector<8x1xf32>
    %4 = vector.shape_cast %3 : vector<8x1xf32> to vector<8x1x1xf32>
    %cst_3 = arith.constant 2.560000e+02 : f32
    %5 = vector.broadcast %cst_3 : f32 to vector<8x1x1xf32>
    %6 = arith.divf %4, %5 : vector<8x1x1xf32>
    %7 = vector.broadcast %6 : vector<8x1x1xf32> to vector<8x4x64xf32>
    %8 = arith.subf %0, %7 : vector<8x4x64xf32>
    %9 = arith.mulf %8, %8 : vector<8x4x64xf32>
    %cst_4 = arith.constant dense<0.000000e+00> : vector<8x4xf32>
    %10 = vector.multi_reduction <add>, %9, %cst_4 [2] : vector<8x4x64xf32> to vector<8x4xf32>
    %11 = vector.shape_cast %10 : vector<8x4xf32> to vector<8x4x1xf32>
    %cst_5 = arith.constant dense<0.000000e+00> : vector<8x1xf32>
    %12 = vector.multi_reduction <add>, %11, %cst_5 [1] : vector<8x4x1xf32> to vector<8x1xf32>
    %13 = vector.shape_cast %12 : vector<8x1xf32> to vector<8x1x1xf32>
    %cst_6 = arith.constant 2.560000e+02 : f32
    %14 = vector.broadcast %cst_6 : f32 to vector<8x1x1xf32>
    %15 = arith.divf %13, %14 : vector<8x1x1xf32>
    %cst_7 = arith.constant 9.99999974E-6 : f32
    %16 = vector.broadcast %cst_7 : f32 to vector<8x1x1xf32>
    %17 = arith.addf %15, %16 : vector<8x1x1xf32>
    %18 = math.rsqrt %17 : vector<8x1x1xf32>
    %19 = vector.broadcast %18 : vector<8x1x1xf32> to vector<8x4x64xf32>
    %20 = arith.mulf %8, %19 : vector<8x4x64xf32>
    %c0_8 = arith.constant 0 : index
    %c0_9 = arith.constant 0 : index
    %c0_10 = arith.constant 0 : index
    %21 = vector.load %arg2[%c0_8, %c0_9, %c0_10] : memref<8x4x1xf32, #tpu.memory_space<vmem>>, vector<8x4x1xf32>
    %c0_11 = arith.constant 0 : index
    %c0_12 = arith.constant 0 : index
    %c0_13 = arith.constant 0 : index
    %22 = vector.load %arg3[%c0_11, %c0_12, %c0_13] : memref<8x4x1xf32, #tpu.memory_space<vmem>>, vector<8x4x1xf32>
    %23 = vector.broadcast %21 : vector<8x4x1xf32> to vector<8x4x64xf32>
    %24 = arith.mulf %20, %23 : vector<8x4x64xf32>
    %25 = vector.broadcast %22 : vector<8x4x1xf32> to vector<8x4x64xf32>
    %26 = arith.addf %24, %25 : vector<8x4x64xf32>
    %c0_14 = arith.constant 0 : index
    %c0_15 = arith.constant 0 : index
    %c0_16 = arith.constant 0 : index
    %27 = vector.load %arg4[%c0_14, %c0_15, %c0_16] : memref<8x4x64xf32, #tpu.memory_space<vmem>>, vector<8x4x64xf32>
    tpu.vector_store %arg4[%c0_14, %c0_15, %c0_16], %26 {strides = array<i32>} : memref<8x4x64xf32, #tpu.memory_space<vmem>>, vector<8x4x64xf32>,
    return
  }
  func.func @transform_0(%arg0: i32) -> (i32, i32, i32) {
    %c0_i32 = arith.constant 0 : i32
    %c0_i32_0 = arith.constant 0 : i32
    %c0_i32_1 = arith.constant 0 : i32
    return %arg0, %c0_i32, %c0_i32_0 : i32, i32, i32
  }
  func.func @transform_1(%arg0: i32) -> (i32, i32, i32) {
    %c0_i32 = arith.constant 0 : i32
    %c0_i32_0 = arith.constant 0 : i32
    %c0_i32_1 = arith.constant 0 : i32
    %c0_i32_2 = arith.constant 0 : i32
    return %c0_i32, %c0_i32_0, %c0_i32_1 : i32, i32, i32
  }
  func.func @transform_2(%arg0: i32) -> (i32, i32, i32) {
    %c0_i32 = arith.constant 0 : i32
    %c0_i32_0 = arith.constant 0 : i32
    %c0_i32_1 = arith.constant 0 : i32
    %c0_i32_2 = arith.constant 0 : i32
    return %c0_i32, %c0_i32_0, %c0_i32_1 : i32, i32, i32
  }
  func.func @transform_3(%arg0: i32) -> (i32, i32, i32) {
    %c0_i32 = arith.constant 0 : i32
    %c0_i32_0 = arith.constant 0 : i32
    %c0_i32_1 = arith.constant 0 : i32
    return %arg0, %c0_i32, %c0_i32_0 : i32, i32, i32
  }
}

module attributes {stable_mosaic.version = 11 : i64} {
  func.func @_linear_kernel(%arg0: i32, %arg1: memref<64x32xf32, #tpu.memory_space<vmem>>, %arg2: memref<32x96xf32, #tpu.memory_space<vmem>>, %arg3: memref<1x96xf32, #tpu.memory_space<vmem>>, %arg4: memref<64x96xf32, #tpu.memory_space<vmem>>) attributes {dimension_semantics = [#tpu.dimension_semantics<parallel>], iteration_bounds = array<i64: 2>, scalar_prefetch = 0 : i64, scratch_operands = 0 : i64, tpu.core_type = #tpu.core_type<tc>, window_params = [{transform_indices = @transform_0, window_bounds = array<i64: 64, 32>}, {pipeline_mode = #tpu.pipeline_mode<synchronous>, transform_indices = @transform_1, window_bounds = array<i64: 32, 96>}, {pipeline_mode = #tpu.pipeline_mode<synchronous>, transform_indices = @transform_2, window_bounds = array<i64: 1, 96>}, {transform_indices = @transform_3, window_bounds = array<i64: 64, 96>}]} {
    %c0 = arith.constant 0 : index
    %c0_0 = arith.constant 0 : index
    %0 = vector.load %arg1[%c0, %c0_0] : memref<64x32xf32, #tpu.memory_space<vmem>>, vector<64x32xf32>
    %1 = arith.truncf %0 : vector<64x32xf32> to vector<64x32xbf16>
    %c0_1 = arith.constant 0 : index
    %c0_2 = arith.constant 0 : index
    %2 = vector.load %arg2[%c0_1, %c0_2] : memref<32x96xf32, #tpu.memory_space<vmem>>, vector<32x96xf32>
    %3 = arith.truncf %2 : vector<32x96xf32> to vector<32x96xbf16>
    %cst = arith.constant dense<0.000000e+00> : vector<64x96xf32>
    %4 = tpu.matmul %1, %3, %cst {dimension_numbers = #tpu.dot_dimension_numbers<[1], [0], [0], [1], [0, 0, 1, 1], [], []>} : vector<64x32xbf16>, vector<32x96xbf16>, vector<64x96xf32> -> vector<64x96xf32>
    %c0_3 = arith.constant 0 : index
    %c0_4 = arith.constant 0 : index
    %5 = vector.load %arg3[%c0_3, %c0_4] : memref<1x96xf32, #tpu.memory_space<vmem>>, vector<1x96xf32>
    %6 = vector.broadcast %5 : vector<1x96xf32> to vector<64x96xf32>
    %7 = arith.addf %4, %6 : vector<64x96xf32>
    %c0_5 = arith.constant 0 : index
    %c0_6 = arith.constant 0 : index
    %8 = vector.load %arg4[%c0_5, %c0_6] : memref<64x96xf32, #tpu.memory_space<vmem>>, vector<64x96xf32>
    tpu.vector_store %arg4[%c0_5, %c0_6], %7 {strides = array<i32>} : memref<64x96xf32, #tpu.memory_space<vmem>>, vector<64x96xf32>,
    return
  }
  func.func @transform_0(%arg0: i32) -> (i32, i32) {
    %c0_i32 = arith.constant 0 : i32
    %c0_i32_0 = arith.constant 0 : i32
    return %arg0, %c0_i32 : i32, i32
  }
  func.func @transform_1(%arg0: i32) -> (i32, i32) {
    %c0_i32 = arith.constant 0 : i32
    %c0_i32_0 = arith.constant 0 : i32
    %c0_i32_1 = arith.constant 0 : i32
    return %c0_i32, %c0_i32_0 : i32, i32
  }
  func.func @transform_2(%arg0: i32) -> (i32, i32) {
    %c0_i32 = arith.constant 0 : i32
    %c0_i32_0 = arith.constant 0 : i32
    %c0_i32_1 = arith.constant 0 : i32
    return %c0_i32, %c0_i32_0 : i32, i32
  }
  func.func @transform_3(%arg0: i32) -> (i32, i32) {
    %c0_i32 = arith.constant 0 : i32
    %c0_i32_0 = arith.constant 0 : i32
    return %arg0, %c0_i32 : i32, i32
  }
}

module attributes {stable_mosaic.version = 11 : i64} {
  func.func @_attn_kernel(%arg0: i32, %arg1: memref<1x2x8x128xf32, #tpu.memory_space<vmem>>, %arg2: memref<1x2x8x128xf32, #tpu.memory_space<vmem>>, %arg3: memref<1x2x8x128xf32, #tpu.memory_space<vmem>>, %arg4: memref<2x8x128xf32, #tpu.memory_space<vmem>>) attributes {dimension_semantics = [#tpu.dimension_semantics<parallel>], iteration_bounds = array<i64: 2>, scalar_prefetch = 0 : i64, scratch_operands = 0 : i64, tpu.core_type = #tpu.core_type<tc>, window_params = [{transform_indices = @transform_0, window_bounds = array<i64: 1, 2, 8, 128>}, {transform_indices = @transform_1, window_bounds = array<i64: 1, 2, 8, 128>}, {transform_indices = @transform_2, window_bounds = array<i64: 1, 2, 8, 128>}, {transform_indices = @transform_3, window_bounds = array<i64: 2, 8, 128>}]} {
    %c0 = arith.constant 0 : index
    %c0_0 = arith.constant 0 : index
    %c0_1 = arith.constant 0 : index
    %c0_2 = arith.constant 0 : index
    %0 = vector.load %arg1[%c0, %c0_0, %c0_1, %c0_2] : memref<1x2x8x128xf32, #tpu.memory_space<vmem>>, vector<1x2x8x128xf32>
    %1 = vector.shape_cast %0 : vector<1x2x8x128xf32> to vector<2x8x128xf32>
    %cst = arith.constant 0.353553385 : f32
    %2 = vector.broadcast %cst : f32 to vector<2x8x128xf32>
    %3 = arith.mulf %1, %2 : vector<2x8x128xf32>
    %c0_3 = arith.constant 0 : index
    %c0_4 = arith.constant 0 : index
    %c0_5 = arith.constant 0 : index
    %c0_6 = arith.constant 0 : index
    %4 = vector.load %arg2[%c0_3, %c0_4, %c0_5, %c0_6] : memref<1x2x8x128xf32, #tpu.memory_space<vmem>>, vector<1x2x8x128xf32>
    %5 = vector.shape_cast %4 : vector<1x2x8x128xf32> to vector<2x8x128xf32>
    %c0_7 = arith.constant 0 : index
    %c0_8 = arith.constant 0 : index
    %c0_9 = arith.constant 0 : index
    %c0_10 = arith.constant 0 : index
    %6 = vector.load %arg3[%c0_7, %c0_8, %c0_9, %c0_10] : memref<1x2x8x128xf32, #tpu.memory_space<vmem>>, vector<1x2x8x128xf32>
    %7 = vector.shape_cast %6 : vector<1x2x8x128xf32> to vector<2x8x128xf32>
    %8 = vector.shape_cast %3 : vector<2x8x128xf32> to vector<2x1x8x128xf32>
    %9 = vector.shape_cast %5 : vector<2x8x128xf32> to vector<1x2x8x128xf32>
    %10 = vector.broadcast %8 : vector<2x1x8x128xf32> to vector<2x2x8x128xf32>
    %11 = vector.broadcast %9 : vector<1x2x8x128xf32> to vector<2x2x8x128xf32>
    %12 = arith.mulf %10, %11 : vector<2x2x8x128xf32>
    %cst_11 = arith.constant dense<0.000000e+00> : vector<2x2x128xf32>
    %13 = vector.multi_reduction <add>, %12, %cst_11 [2] : vector<2x2x8x128xf32> to vector<2x2x128xf32>
    %cst_12 = arith.constant dense<0xFF800000> : vector<2x128xf32>
    %14 = vector.multi_reduction <maximumf>, %13, %cst_12 [1] : vector<2x2x128xf32> to vector<2x128xf32>
    %15 = vector.shape_cast %14 : vector<2x128xf32> to vector<2x1x128xf32>
    %16 = vector.broadcast %15 : vector<2x1x128xf32> to vector<2x2x128xf32>
    %17 = arith.subf %13, %16 : vector<2x2x128xf32>
    %18 = math.exp %17 : vector<2x2x128xf32>
    %cst_13 = arith.constant dense<0.000000e+00> : vector<2x128xf32>
    %19 = vector.multi_reduction <add>, %18, %cst_13 [1] : vector<2x2x128xf32> to vector<2x128xf32>
    %20 = tpu.reciprocal %19 {approx = true} : vector<2x128xf32> -> vector<2x128xf32>
    %21 = vector.shape_cast %18 : vector<2x2x128xf32> to vector<2x2x1x128xf32>
    %22 = vector.shape_cast %7 : vector<2x8x128xf32> to vector<1x2x8x128xf32>
    %23 = vector.broadcast %21 : vector<2x2x1x128xf32> to vector<2x2x8x128xf32>
    %24 = vector.broadcast %22 : vector<1x2x8x128xf32> to vector<2x2x8x128xf32>
    %25 = arith.mulf %23, %24 : vector<2x2x8x128xf32>
    %cst_14 = arith.constant dense<0.000000e+00> : vector<2x8x128xf32>
    %26 = vector.multi_reduction <add>, %25, %cst_14 [1] : vector<2x2x8x128xf32> to vector<2x8x128xf32>
    %27 = vector.shape_cast %20 : vector<2x128xf32> to vector<2x1x128xf32>
    %28 = vector.broadcast %27 : vector<2x1x128xf32> to vector<2x8x128xf32>
    %29 = arith.mulf %26, %28 : vector<2x8x128xf32>
    %c0_15 = arith.constant 0 : index
    %c0_16 = arith.constant 0 : index
    %c0_17 = arith.constant 0 : index
    %30 = vector.load %arg4[%c0_15, %c0_16, %c0_17] : memref<2x8x128xf32, #tpu.memory_space<vmem>>, vector<2x8x128xf32>
    tpu.vector_store %arg4[%c0_15, %c0_16, %c0_17], %29 {strides = array<i32>} : memref<2x8x128xf32, #tpu.memory_space<vmem>>, vector<2x8x128xf32>,
    return
  }
  func.func @transform_0(%arg0: i32) -> (i32, i32, i32, i32) {
    %c0_i32 = arith.constant 0 : i32
    %c0_i32_0 = arith.constant 0 : i32
    %c0_i32_1 = arith.constant 0 : i32
    %c0_i32_2 = arith.constant 0 : i32
    return %c0_i32, %c0_i32_0, %c0_i32_1, %arg0 : i32, i32, i32, i32
  }
  func.func @transform_1(%arg0: i32) -> (i32, i32, i32, i32) {
    %c1_i32 = arith.constant 1 : i32
    %c0_i32 = arith.constant 0 : i32
    %c0_i32_0 = arith.constant 0 : i32
    %c0_i32_1 = arith.constant 0 : i32
    return %c1_i32, %c0_i32, %c0_i32_0, %arg0 : i32, i32, i32, i32
  }
  func.func @transform_2(%arg0: i32) -> (i32, i32, i32, i32) {
    %c2_i32 = arith.constant 2 : i32
    %c0_i32 = arith.constant 0 : i32
    %c0_i32_0 = arith.constant 0 : i32
    %c0_i32_1 = arith.constant 0 : i32
    return %c2_i32, %c0_i32, %c0_i32_0, %arg0 : i32, i32, i32, i32
  }
  func.func @transform_3(%arg0: i32) -> (i32, i32, i32) {
    %c0_i32 = arith.constant 0 : i32
    %c0_i32_0 = arith.constant 0 : i32
    %c0_i32_1 = arith.constant 0 : i32
    return %c0_i32, %c0_i32_0, %arg0 : i32, i32, i32
  }
}

module attributes {stable_mosaic.version = 11 : i64} {
  func.func @_linear_kernel(%arg0: i32, %arg1: memref<64x32xf32, #tpu.memory_space<vmem>>, %arg2: memref<32x32xf32, #tpu.memory_space<vmem>>, %arg3: memref<1x32xf32, #tpu.memory_space<vmem>>, %arg4: memref<64x32xf32, #tpu.memory_space<vmem>>) attributes {dimension_semantics = [#tpu.dimension_semantics<parallel>], iteration_bounds = array<i64: 2>, scalar_prefetch = 0 : i64, scratch_operands = 0 : i64, tpu.core_type = #tpu.core_type<tc>, window_params = [{transform_indices = @transform_0, window_bounds = array<i64: 64, 32>}, {pipeline_mode = #tpu.pipeline_mode<synchronous>, transform_indices = @transform_1, window_bounds = array<i64: 32, 32>}, {pipeline_mode = #tpu.pipeline_mode<synchronous>, transform_indices = @transform_2, window_bounds = array<i64: 1, 32>}, {transform_indices = @transform_3, window_bounds = array<i64: 64, 32>}]} {
    %c0 = arith.constant 0 : index
    %c0_0 = arith.constant 0 : index
    %0 = vector.load %arg1[%c0, %c0_0] : memref<64x32xf32, #tpu.memory_space<vmem>>, vector<64x32xf32>
    %1 = arith.truncf %0 : vector<64x32xf32> to vector<64x32xbf16>
    %c0_1 = arith.constant 0 : index
    %c0_2 = arith.constant 0 : index
    %2 = vector.load %arg2[%c0_1, %c0_2] : memref<32x32xf32, #tpu.memory_space<vmem>>, vector<32x32xf32>
    %3 = arith.truncf %2 : vector<32x32xf32> to vector<32x32xbf16>
    %cst = arith.constant dense<0.000000e+00> : vector<64x32xf32>
    %4 = tpu.matmul %1, %3, %cst {dimension_numbers = #tpu.dot_dimension_numbers<[1], [0], [0], [1], [0, 0, 1, 1], [], []>} : vector<64x32xbf16>, vector<32x32xbf16>, vector<64x32xf32> -> vector<64x32xf32>
    %c0_3 = arith.constant 0 : index
    %c0_4 = arith.constant 0 : index
    %5 = vector.load %arg3[%c0_3, %c0_4] : memref<1x32xf32, #tpu.memory_space<vmem>>, vector<1x32xf32>
    %6 = vector.broadcast %5 : vector<1x32xf32> to vector<64x32xf32>
    %7 = arith.addf %4, %6 : vector<64x32xf32>
    %c0_5 = arith.constant 0 : index
    %c0_6 = arith.constant 0 : index
    %8 = vector.load %arg4[%c0_5, %c0_6] : memref<64x32xf32, #tpu.memory_space<vmem>>, vector<64x32xf32>
    tpu.vector_store %arg4[%c0_5, %c0_6], %7 {strides = array<i32>} : memref<64x32xf32, #tpu.memory_space<vmem>>, vector<64x32xf32>,
    return
  }
  func.func @transform_0(%arg0: i32) -> (i32, i32) {
    %c0_i32 = arith.constant 0 : i32
    %c0_i32_0 = arith.constant 0 : i32
    return %arg0, %c0_i32 : i32, i32
  }
  func.func @transform_1(%arg0: i32) -> (i32, i32) {
    %c0_i32 = arith.constant 0 : i32
    %c0_i32_0 = arith.constant 0 : i32
    %c0_i32_1 = arith.constant 0 : i32
    return %c0_i32, %c0_i32_0 : i32, i32
  }
  func.func @transform_2(%arg0: i32) -> (i32, i32) {
    %c0_i32 = arith.constant 0 : i32
    %c0_i32_0 = arith.constant 0 : i32
    %c0_i32_1 = arith.constant 0 : i32
    return %c0_i32, %c0_i32_0 : i32, i32
  }
  func.func @transform_3(%arg0: i32) -> (i32, i32) {
    %c0_i32 = arith.constant 0 : i32
    %c0_i32_0 = arith.constant 0 : i32
    return %arg0, %c0_i32 : i32, i32
  }
}

module attributes {stable_mosaic.version = 11 : i64} {
  func.func @_groupnorm_kernel(%arg0: i32, %arg1: memref<8x4x64xf32, #tpu.memory_space<vmem>>, %arg2: memref<8x4x64xf32, #tpu.memory_space<vmem>>, %arg3: memref<8x4x1xf32, #tpu.memory_space<vmem>>, %arg4: memref<8x4x1xf32, #tpu.memory_space<vmem>>, %arg5: memref<8x4x64xf32, #tpu.memory_space<vmem>>) attributes {dimension_semantics = [#tpu.dimension_semantics<parallel>], iteration_bounds = array<i64: 2>, scalar_prefetch = 0 : i64, scratch_operands = 0 : i64, tpu.core_type = #tpu.core_type<tc>, window_params = [{transform_indices = @transform_0, window_bounds = array<i64: 8, 4, 64>}, {transform_indices = @transform_1, window_bounds = array<i64: 8, 4, 64>}, {pipeline_mode = #tpu.pipeline_mode<synchronous>, transform_indices = @transform_2, window_bounds = array<i64: 8, 4, 1>}, {pipeline_mode = #tpu.pipeline_mode<synchronous>, transform_indices = @transform_3, window_bounds = array<i64: 8, 4, 1>}, {transform_indices = @transform_4, window_bounds = array<i64: 8, 4, 64>}]} {
    %c0 = arith.constant 0 : index
    %c0_0 = arith.constant 0 : index
    %c0_1 = arith.constant 0 : index
    %0 = vector.load %arg1[%c0, %c0_0, %c0_1] : memref<8x4x64xf32, #tpu.memory_space<vmem>>, vector<8x4x64xf32>
    %c0_2 = arith.constant 0 : index
    %c0_3 = arith.constant 0 : index
    %c0_4 = arith.constant 0 : index
    %1 = vector.load %arg2[%c0_2, %c0_3, %c0_4] : memref<8x4x64xf32, #tpu.memory_space<vmem>>, vector<8x4x64xf32>
    %2 = arith.addf %0, %1 : vector<8x4x64xf32>
    %cst = arith.constant dense<0.000000e+00> : vector<8x4xf32>
    %3 = vector.multi_reduction <add>, %2, %cst [2] : vector<8x4x64xf32> to vector<8x4xf32>
    %4 = vector.shape_cast %3 : vector<8x4xf32> to vector<8x4x1xf32>
    %cst_5 = arith.constant dense<0.000000e+00> : vector<8x1xf32>
    %5 = vector.multi_reduction <add>, %4, %cst_5 [1] : vector<8x4x1xf32> to vector<8x1xf32>
    %6 = vector.shape_cast %5 : vector<8x1xf32> to vector<8x1x1xf32>
    %cst_6 = arith.constant 2.560000e+02 : f32
    %7 = vector.broadcast %cst_6 : f32 to vector<8x1x1xf32>
    %8 = arith.divf %6, %7 : vector<8x1x1xf32>
    %9 = vector.broadcast %8 : vector<8x1x1xf32> to vector<8x4x64xf32>
    %10 = arith.subf %2, %9 : vector<8x4x64xf32>
    %11 = arith.mulf %10, %10 : vector<8x4x64xf32>
    %cst_7 = arith.constant dense<0.000000e+00> : vector<8x4xf32>
    %12 = vector.multi_reduction <add>, %11, %cst_7 [2] : vector<8x4x64xf32> to vector<8x4xf32>
    %13 = vector.shape_cast %12 : vector<8x4xf32> to vector<8x4x1xf32>
    %cst_8 = arith.constant dense<0.000000e+00> : vector<8x1xf32>
    %14 = vector.multi_reduction <add>, %13, %cst_8 [1] : vector<8x4x1xf32> to vector<8x1xf32>
    %15 = vector.shape_cast %14 : vector<8x1xf32> to vector<8x1x1xf32>
    %cst_9 = arith.constant 2.560000e+02 : f32
    %16 = vector.broadcast %cst_9 : f32 to vector<8x1x1xf32>
    %17 = arith.divf %15, %16 : vector<8x1x1xf32>
    %cst_10 = arith.constant 9.99999974E-6 : f32
    %18 = vector.broadcast %cst_10 : f32 to vector<8x1x1xf32>
    %19 = arith.addf %17, %18 : vector<8x1x1xf32>
    %20 = math.rsqrt %19 : vector<8x1x1xf32>
    %21 = vector.broadcast %20 : vector<8x1x1xf32> to vector<8x4x64xf32>
    %22 = arith.mulf %10, %21 : vector<8x4x64xf32>
    %c0_11 = arith.constant 0 : index
    %c0_12 = arith.constant 0 : index
    %c0_13 = arith.constant 0 : index
    %23 = vector.load %arg3[%c0_11, %c0_12, %c0_13] : memref<8x4x1xf32, #tpu.memory_space<vmem>>, vector<8x4x1xf32>
    %c0_14 = arith.constant 0 : index
    %c0_15 = arith.constant 0 : index
    %c0_16 = arith.constant 0 : index
    %24 = vector.load %arg4[%c0_14, %c0_15, %c0_16] : memref<8x4x1xf32, #tpu.memory_space<vmem>>, vector<8x4x1xf32>
    %25 = vector.broadcast %23 : vector<8x4x1xf32> to vector<8x4x64xf32>
    %26 = arith.mulf %22, %25 : vector<8x4x64xf32>
    %27 = vector.broadcast %24 : vector<8x4x1xf32> to vector<8x4x64xf32>
    %28 = arith.addf %26, %27 : vector<8x4x64xf32>
    %c0_17 = arith.constant 0 : index
    %c0_18 = arith.constant 0 : index
    %c0_19 = arith.constant 0 : index
    %29 = vector.load %arg5[%c0_17, %c0_18, %c0_19] : memref<8x4x64xf32, #tpu.memory_space<vmem>>, vector<8x4x64xf32>
    tpu.vector_store %arg5[%c0_17, %c0_18, %c0_19], %28 {strides = array<i32>} : memref<8x4x64xf32, #tpu.memory_space<vmem>>, vector<8x4x64xf32>,
    return
  }
  func.func @transform_0(%arg0: i32) -> (i32, i32, i32) {
    %c0_i32 = arith.constant 0 : i32
    %c0_i32_0 = arith.constant 0 : i32
    %c0_i32_1 = arith.constant 0 : i32
    return %arg0, %c0_i32, %c0_i32_0 : i32, i32, i32
  }
  func.func @transform_1(%arg0: i32) -> (i32, i32, i32) {
    %c0_i32 = arith.constant 0 : i32
    %c0_i32_0 = arith.constant 0 : i32
    %c0_i32_1 = arith.constant 0 : i32
    return %arg0, %c0_i32, %c0_i32_0 : i32, i32, i32
  }
  func.func @transform_2(%arg0: i32) -> (i32, i32, i32) {
    %c0_i32 = arith.constant 0 : i32
    %c0_i32_0 = arith.constant 0 : i32
    %c0_i32_1 = arith.constant 0 : i32
    %c0_i32_2 = arith.constant 0 : i32
    return %c0_i32, %c0_i32_0, %c0_i32_1 : i32, i32, i32
  }
  func.func @transform_3(%arg0: i32) -> (i32, i32, i32) {
    %c0_i32 = arith.constant 0 : i32
    %c0_i32_0 = arith.constant 0 : i32
    %c0_i32_1 = arith.constant 0 : i32
    %c0_i32_2 = arith.constant 0 : i32
    return %c0_i32, %c0_i32_0, %c0_i32_1 : i32, i32, i32
  }
  func.func @transform_4(%arg0: i32) -> (i32, i32, i32) {
    %c0_i32 = arith.constant 0 : i32
    %c0_i32_0 = arith.constant 0 : i32
    %c0_i32_1 = arith.constant 0 : i32
    return %arg0, %c0_i32, %c0_i32_0 : i32, i32, i32
  }
}

module attributes {stable_mosaic.version = 11 : i64} {
  func.func @_ffn_kernel(%arg0: i32, %arg1: memref<64x32xf32, #tpu.memory_space<vmem>>, %arg2: memref<32x128xf32, #tpu.memory_space<vmem>>, %arg3: memref<1x128xf32, #tpu.memory_space<vmem>>, %arg4: memref<128x32xf32, #tpu.memory_space<vmem>>, %arg5: memref<1x32xf32, #tpu.memory_space<vmem>>, %arg6: memref<64x32xf32, #tpu.memory_space<vmem>>) attributes {dimension_semantics = [#tpu.dimension_semantics<parallel>], iteration_bounds = array<i64: 2>, scalar_prefetch = 0 : i64, scratch_operands = 0 : i64, tpu.core_type = #tpu.core_type<tc>, window_params = [{transform_indices = @transform_0, window_bounds = array<i64: 64, 32>}, {pipeline_mode = #tpu.pipeline_mode<synchronous>, transform_indices = @transform_1, window_bounds = array<i64: 32, 128>}, {pipeline_mode = #tpu.pipeline_mode<synchronous>, transform_indices = @transform_2, window_bounds = array<i64: 1, 128>}, {pipeline_mode = #tpu.pipeline_mode<synchronous>, transform_indices = @transform_3, window_bounds = array<i64: 128, 32>}, {pipeline_mode = #tpu.pipeline_mode<synchronous>, transform_indices = @transform_4, window_bounds = array<i64: 1, 32>}, {transform_indices = @transform_5, window_bounds = array<i64: 64, 32>}]} {
    %c0 = arith.constant 0 : index
    %c0_0 = arith.constant 0 : index
    %0 = vector.load %arg1[%c0, %c0_0] : memref<64x32xf32, #tpu.memory_space<vmem>>, vector<64x32xf32>
    %1 = arith.truncf %0 : vector<64x32xf32> to vector<64x32xbf16>
    %c0_1 = arith.constant 0 : index
    %c0_2 = arith.constant 0 : index
    %2 = vector.load %arg2[%c0_1, %c0_2] : memref<32x128xf32, #tpu.memory_space<vmem>>, vector<32x128xf32>
    %3 = arith.truncf %2 : vector<32x128xf32> to vector<32x128xbf16>
    %cst = arith.constant dense<0.000000e+00> : vector<64x128xf32>
    %4 = tpu.matmul %1, %3, %cst {dimension_numbers = #tpu.dot_dimension_numbers<[1], [0], [0], [1], [0, 0, 1, 1], [], []>} : vector<64x32xbf16>, vector<32x128xbf16>, vector<64x128xf32> -> vector<64x128xf32>
    %c0_3 = arith.constant 0 : index
    %c0_4 = arith.constant 0 : index
    %5 = vector.load %arg3[%c0_3, %c0_4] : memref<1x128xf32, #tpu.memory_space<vmem>>, vector<1x128xf32>
    %6 = vector.broadcast %5 : vector<1x128xf32> to vector<64x128xf32>
    %7 = arith.addf %4, %6 : vector<64x128xf32>
    %8 = arith.negf %7 : vector<64x128xf32>
    %9 = math.exp %8 : vector<64x128xf32>
    %cst_5 = arith.constant 1.000000e+00 : f32
    %10 = vector.broadcast %cst_5 : f32 to vector<64x128xf32>
    %11 = arith.addf %10, %9 : vector<64x128xf32>
    %12 = arith.divf %10, %11 : vector<64x128xf32>
    %13 = arith.mulf %7, %12 : vector<64x128xf32>
    %14 = arith.truncf %13 : vector<64x128xf32> to vector<64x128xbf16>
    %c0_6 = arith.constant 0 : index
    %c0_7 = arith.constant 0 : index
    %15 = vector.load %arg4[%c0_6, %c0_7] : memref<128x32xf32, #tpu.memory_space<vmem>>, vector<128x32xf32>
    %16 = arith.truncf %15 : vector<128x32xf32> to vector<128x32xbf16>
    %cst_8 = arith.constant dense<0.000000e+00> : vector<64x32xf32>
    %17 = tpu.matmul %14, %16, %cst_8 {dimension_numbers = #tpu.dot_dimension_numbers<[1], [0], [0], [1], [0, 0, 1, 1], [], []>} : vector<64x128xbf16>, vector<128x32xbf16>, vector<64x32xf32> -> vector<64x32xf32>
    %c0_9 = arith.constant 0 : index
    %c0_10 = arith.constant 0 : index
    %18 = vector.load %arg5[%c0_9, %c0_10] : memref<1x32xf32, #tpu.memory_space<vmem>>, vector<1x32xf32>
    %19 = vector.broadcast %18 : vector<1x32xf32> to vector<64x32xf32>
    %20 = arith.addf %17, %19 : vector<64x32xf32>
    %21 = arith.addf %0, %20 : vector<64x32xf32>
    %c0_11 = arith.constant 0 : index
    %c0_12 = arith.constant 0 : index
    %22 = vector.load %arg6[%c0_11, %c0_12] : memref<64x32xf32, #tpu.memory_space<vmem>>, vector<64x32xf32>
    tpu.vector_store %arg6[%c0_11, %c0_12], %21 {strides = array<i32>} : memref<64x32xf32, #tpu.memory_space<vmem>>, vector<64x32xf32>,
    return
  }
  func.func @transform_0(%arg0: i32) -> (i32, i32) {
    %c0_i32 = arith.constant 0 : i32
    %c0_i32_0 = arith.constant 0 : i32
    return %arg0, %c0_i32 : i32, i32
  }
  func.func @transform_1(%arg0: i32) -> (i32, i32) {
    %c0_i32 = arith.constant 0 : i32
    %c0_i32_0 = arith.constant 0 : i32
    %c0_i32_1 = arith.constant 0 : i32
    return %c0_i32, %c0_i32_0 : i32, i32
  }
  func.func @transform_2(%arg0: i32) -> (i32, i32) {
    %c0_i32 = arith.constant 0 : i32
    %c0_i32_0 = arith.constant 0 : i32
    %c0_i32_1 = arith.constant 0 : i32
    return %c0_i32, %c0_i32_0 : i32, i32
  }
  func.func @transform_3(%arg0: i32) -> (i32, i32) {
    %c0_i32 = arith.constant 0 : i32
    %c0_i32_0 = arith.constant 0 : i32
    %c0_i32_1 = arith.constant 0 : i32
    return %c0_i32, %c0_i32_0 : i32, i32
  }
  func.func @transform_4(%arg0: i32) -> (i32, i32) {
    %c0_i32 = arith.constant 0 : i32
    %c0_i32_0 = arith.constant 0 : i32
    %c0_i32_1 = arith.constant 0 : i32
    return %c0_i32, %c0_i32_0 : i32, i32
  }
  func.func @transform_5(%arg0: i32) -> (i32, i32) {
    %c0_i32 = arith.constant 0 : i32
    %c0_i32_0 = arith.constant 0 : i32
    return %arg0, %c0_i32 : i32, i32
  }
}

</mosaic_0001>

<bundles_post_ra>
// kernel: self_attention_forward.6
= control target key start
LH: loop header
LB: loop body
LE: loop exit
PB: predicated region body
PF: predicated region fallthrough
CT: control target
= control target key end

     0   :  { %s644_s12 = smov 0   ;;  %s871_s0 = inlined_call_operand.vmem [shape: f32[16,4,64], index: 0, kind: input, shape index: {}]   ;;  %s872_s1 = inlined_call_operand.vmem [shape: f32[8,4,1], index: 1, kind: input, shape index: {}]   ;;  %s873_s2 = inlined_call_operand.vmem [shape: f32[8,4,1], index: 2, kind: input, shape index: {}]   ;;  %s874_s3 = inlined_call_operand.vmem [shape: f32[16,4,64], index: 3, kind: output, shape index: {}]  }
   0x1 LB: > { %s577_s13 = sadd.s32 4294967295, %s621_s12   ;;  %p581_p0 = scmp.ge.s32.totalorder %s621_s12, 1  ;;  %s621_s12 = sphi %s644_s12, %s13_s12  }
   0x2   : > { %p138_p1 = scmp.lt.s32.totalorder %s621_s12, 3 }
   0x4   : > { %p139_p2 = pnand %p581_p0, %p138_p1 }
   0x5   : > { %s582_s14 = sshll.u32 (!%p139_p2), %s577_s13, 3  ;;  %v623_v0 = vmov (!%p139_p2), 0   ;;  %vm182_vm0 = vcmask (!%p139_p2), 519168   ;;  %v402_v17 = vld [vmem:[%s872_s1 + $0x4] sm:$0xf] (!%p139_p2)  ;;  %vm207_vm1 = vcmask (!%p139_p2), 1043456  }
   0x6   : > { %142 = sbr.rel (%p139_p2) target bundleno = 375 (0x177), region = 32  ;;  %p163_p3 = scmp.lt.s32.totalorder (!%p139_p2), %s582_s14, 15  ;;  %598 = vset.pattern.permute.xlu1 (!%p139_p2), %v623_v0  ;;  %597 = vset.pattern.permute.xlu0 (!%p139_p2), %v623_v0  ;;  %v403_v18 = vld [vmem:[%s872_s1 + $0x8] sm:$0xf] (!%p139_p2)  ;;  %v401_v19 = vld [vmem:[%s872_s1] sm:$0xf] (!%p139_p2) }
   0x7   : > { %v404_v20 = vld [vmem:[%s872_s1 + $0xc] sm:$0xf] (!%p139_p2)  ;;  %v410_v21 = vld [vmem:[%s873_s2 + $0x4] sm:$0xf] (!%p139_p2)  ;;  %v405_v22 = vld [vmem:[%s872_s1 + $0x10] sm:$0xf] (!%p139_p2) }
   0x8   : > { %v406_v23 = vld [vmem:[%s872_s1 + $0x14] sm:$0xf] (!%p139_p2)  ;;  %v407_v24 = vld [vmem:[%s872_s1 + $0x18] sm:$0xf] (!%p139_p2)  ;;  %v408_v25 = vld [vmem:[%s872_s1 + $0x1c] sm:$0xf] (!%p139_p2) }
   0x9   : > { %v409_v26 = vld [vmem:[%s873_s2] sm:$0xf] (!%p139_p2)  ;;  %v411_v27 = vld [vmem:[%s873_s2 + $0x8] sm:$0xf] (!%p139_p2) }
   0xd   : > { %s876_s14 = smov (!%p163_p3, %s582_s14), 15 }
   0xe   : > { %s583_s15 = sshll.u32 %s876_s14, 2 }
   0xf   : > { %s166_s18 = scalar_lea.vmem %s871_s0, %s583_s15  ;;  %s833_s29 = scalar_lea.vmem %s874_s3, %s583_s15 }
  0x10   : > { %v660_v1 = vld [vmem:[%s166_s18 + $0x8] sm:$0xf]  ;;  %v662_v2 = vld [vmem:[%s166_s18] sm:$0xf]  ;;  %v664_v3 = vld [vmem:[%s166_s18 + $0xc] sm:$0xf] }
  0x11   : > { %v189_v4 = vsel %vm182_vm0, %v660_v1, 0.0  ;;  %v183_v5 = vsel %vm182_vm0, %v662_v2, 0.0  ;;  %v670_v6 = vld [vmem:[%s166_s18 + $0x4] sm:$0xf]  ;;  %v192_v7 = vsel %vm182_vm0, %v664_v3, 0.0 }
  0x12   : > { %190 = vadd.xlane.f32.xlu1 %v189_v4  ;;  %184 = vadd.xlane.f32.xlu0 %v183_v5  ;;  %v186_v8 = vsel %vm182_vm0, %v670_v6, 0.0  ;;  %v676_v9 = vld [vmem:[%s166_s18 + $0x14] sm:$0xf]  ;;  %v678_v10 = vld [vmem:[%s166_s18 + $0x10] sm:$0xf] }
  0x13   : > { %v198_v11 = vsel %vm182_vm0, %v676_v9, 0.0  ;;  %v195_v12 = vsel %vm182_vm0, %v678_v10, 0.0  ;;  %v684_v13 = vld [vmem:[%s166_s18 + $0x1c] sm:$0xf]  ;;  %v686_v14 = vld [vmem:[%s166_s18 + $0x18] sm:$0xf] }
  0x14   : > { %v204_v15 = vsel %vm182_vm0, %v684_v13, 0.0  ;;  %v201_v16 = vsel %vm182_vm0, %v686_v14, 0.0 }
  0x16   : > { %193 = vadd.xlane.f32.xlu1 %v192_v7  ;;  %187 = vadd.xlane.f32.xlu0 %v186_v8 }
  0x1a   : > { %199 = vadd.xlane.f32.xlu1 %v198_v11  ;;  %196 = vadd.xlane.f32.xlu0 %v195_v12 }
  0x1e   : > { %205 = vadd.xlane.f32.xlu1 %v204_v15  ;;  %202 = vadd.xlane.f32.xlu0 %v201_v16 }
  0x2f   : > { %424 = vperm.xlu1 %598, %v402_v17  }
  0x33   : > { %429 = vperm.xlu1 %598, %v403_v18  }
  0x34   : > { %419 = vperm.xlu0 %597, %v401_v19  }
  0x37   : > { %434 = vperm.xlu1 %598, %v404_v20  }
  0x38   : > { %472 = vperm.xlu0 %597, %v410_v21  }
  0x3b   : > { %439 = vperm.xlu1 %598, %v405_v22  }
  0x3f   : > { %444 = vperm.xlu1 %598, %v406_v23  }
  0x43   : > { %449 = vperm.xlu1 %598, %v407_v24  }
  0x47   : > { %454 = vperm.xlu1 %598, %v408_v25  }
  0x4b   : > { %467 = vperm.xlu1 %598, %v409_v26  }
  0x4f   : > { %477 = vperm.xlu1 %598, %v411_v27  }
  0x9f   : > { %v191_v28 = vpop.xlane.xlu1 %190  ;;  %v185_v29 = vpop.xlane.xlu0 %184 }
  0xa0   : > { %v222_v30 = vsel %vm207_vm1, %v191_v28, 0.0  ;;  %v208_v31 = vsel %vm207_vm1, %v185_v29, 0.0 }
  0xa1   : > { %v223_v32 = vrot.slane %v222_v30, 4  ;;  %v209_v33 = vrot.slane %v208_v31, 4 }
  0xa3   : > { %v224_v34 = vadd.f32 %v223_v32, %v222_v30  ;;  %v210_v35 = vadd.f32 %v209_v33, %v208_v31  ;;  %v194_v36 = vpop.xlane.xlu1 %193  ;;  %v188_v37 = vpop.xlane.xlu0 %187 }
  0xa4   : > { %v229_v38 = vsel %vm207_vm1, %v194_v36, 0.0  ;;  %v215_v39 = vsel %vm207_vm1, %v188_v37, 0.0 }
  0xa5   : > { %v225_v40 = vrot.slane %v224_v34, 2  ;;  %v211_v41 = vrot.slane %v210_v35, 2  ;;  %v230_v42 = vrot.slane %v229_v38, 4  ;;  %v216_v43 = vrot.slane %v215_v39, 4 }
  0xa7   : > { %v226_v44 = vadd.f32 %v225_v40, %v224_v34  ;;  %v212_v45 = vadd.f32 %v211_v41, %v210_v35  ;;  %v231_v46 = vadd.f32 %v230_v42, %v229_v38  ;;  %v217_v47 = vadd.f32 %v216_v43, %v215_v39  ;;  %v200_v48 = vpop.xlane.xlu1 %199  ;;  %v197_v49 = vpop.xlane.xlu0 %196 }
  0xa8   : > { %v243_v50 = vsel %vm207_vm1, %v200_v48, 0.0  ;;  %v236_v51 = vsel %vm207_vm1, %v197_v49, 0.0 }
  0xa9   : > { %v227_v52 = vrot.slane %v226_v44, 1  ;;  %v213_v53 = vrot.slane %v212_v45, 1  ;;  %v232_v54 = vrot.slane %v231_v46, 2  ;;  %v218_v55 = vrot.slane %v217_v47, 2 }
  0xaa   : > { %v244_v56 = vrot.slane %v243_v50, 4  ;;  %v237_v57 = vrot.slane %v236_v51, 4 }
  0xab   : > { %v228_v58 = vadd.f32 %v227_v52, %v226_v44  ;;  %v214_v59 = vadd.f32 %v213_v53, %v212_v45  ;;  %v233_v60 = vadd.f32 %v232_v54, %v231_v46  ;;  %v219_v61 = vadd.f32 %v218_v55, %v217_v47  ;;  %v206_v62 = vpop.xlane.xlu1 %205  ;;  %v203_v63 = vpop.xlane.xlu0 %202 }
  0xac   : > { %v245_v0 = vadd.f32 %v244_v56, %v243_v50  ;;  %v238_v4 = vadd.f32 %v237_v57, %v236_v51  ;;  %v257_v5 = vsel %vm207_vm1, %v206_v62, 0.0  ;;  %v250_v7 = vsel %vm207_vm1, %v203_v63, 0.0  ;;  %v415_v62 = vld [vmem:[%s873_s2 + $0x18] sm:$0xf]  ;;  %v414_v63 = vld [vmem:[%s873_s2 + $0x14] sm:$0xf] }
  0xad   : > { %v267_v8 = vmul.f32 0.00390625, %v228_v58  ;;  %v265_v11 = vmul.f32 0.00390625, %v214_v59  ;;  %v234_v12 = vrot.slane %v233_v60, 1  ;;  %v220_v15 = vrot.slane %v219_v61, 1 }
  0xae   : > { %v246_v16 = vrot.slane %v245_v0, 2  ;;  %v239_v17 = vrot.slane %v238_v4, 2  ;;  %v258_v18 = vrot.slane %v257_v5, 4  ;;  %v251_v19 = vrot.slane %v250_v7, 4 }
  0xaf   : > { %v235_v20 = vadd.f32 %v234_v12, %v233_v60  ;;  %v221_v21 = vadd.f32 %v220_v15, %v219_v61  ;;  %v734_v22 = vsub.f32 %v662_v2, %v265_v11  ;;  %v737_v23 = vsub.f32 %v660_v1, %v267_v8 }
  0xb0   : > { %v247_v24 = vadd.f32 %v246_v16, %v245_v0  ;;  %v240_v25 = vadd.f32 %v239_v17, %v238_v4  ;;  %v259_v26 = vadd.f32 %v258_v18, %v257_v5  ;;  %v252_v27 = vadd.f32 %v251_v19, %v250_v7  ;;  %v416_v0 = vld [vmem:[%s873_s2 + $0x1c] sm:$0xf]  ;;  %v796_v4 = vpop.permute.xlu1 %424 }
  0xb1   : > { %v268_v28 = vmul.f32 0.00390625, %v235_v20  ;;  %v266_v29 = vmul.f32 0.00390625, %v221_v21  ;;  %v281_v30 = vmul.f32 %v734_v22, %v734_v22  ;;  %v283_v2 = vmul.f32 %v737_v23, %v737_v23 }
  0xb2   : > { %v248_v31 = vrot.slane %v247_v24, 1  ;;  %v241_v32 = vrot.slane %v240_v25, 1  ;;  %v260_v33 = vrot.slane %v259_v26, 2  ;;  %v253_v34 = vrot.slane %v252_v27, 2 }
  0xb3   : > { %v289_v35 = vsel %vm182_vm0, %v281_v30, 0.0  ;;  %v745_v1 = vsub.f32 %v670_v6, %v266_v29  ;;  %v748_v36 = vsub.f32 %v664_v3, %v268_v28  ;;  %v295_v46 = vsel %vm182_vm0, %v283_v2, 0.0  ;;  %v810_v16 = vpop.permute.xlu0 %419 }
  0xb4   : > { %v249_v37 = vadd.f32 %v248_v31, %v247_v24  ;;  %v242_v38 = vadd.f32 %v241_v32, %v240_v25  ;;  %v261_v39 = vadd.f32 %v260_v33, %v259_v26  ;;  %v254_v40 = vadd.f32 %v253_v34, %v252_v27  ;;  %290 = vadd.xlane.f32.xlu0 %v289_v35  ;;  %v798_v5 = vpop.permute.xlu1 %429 }
  0xb5   : > { %v282_v41 = vmul.f32 %v745_v1, %v745_v1  ;;  %v284_v3 = vmul.f32 %v748_v36, %v748_v36 }
  0xb6   : > { %v270_v42 = vmul.f32 0.00390625, %v249_v37  ;;  %v269_v43 = vmul.f32 0.00390625, %v242_v38  ;;  %v262_v44 = vrot.slane %v261_v39, 1  ;;  %v255_v45 = vrot.slane %v254_v40, 1 }
  0xb7   : > { %v292_v6 = vsel %vm182_vm0, %v282_v41, 0.0  ;;  %v298_v54 = vsel %vm182_vm0, %v284_v3, 0.0  ;;  %v814_v18 = vpop.permute.xlu0 %472 }
  0xb8   : > { %v263_v47 = vadd.f32 %v262_v44, %v261_v39  ;;  %v256_v48 = vadd.f32 %v255_v45, %v254_v40  ;;  %296 = vadd.xlane.f32.xlu0 %v295_v46  ;;  %293 = vadd.xlane.f32.xlu1 %v292_v6  ;;  %v757_v49 = vsub.f32 %v678_v10, %v269_v43  ;;  %v800_v7 = vpop.permute.xlu1 %434 }
  0xb9   : > { %v760_v50 = vsub.f32 %v676_v9, %v270_v42 }
  0xba   : > { %v272_v51 = vmul.f32 0.00390625, %v263_v47  ;;  %v271_v52 = vmul.f32 0.00390625, %v256_v48  ;;  %v285_v53 = vmul.f32 %v757_v49, %v757_v49 }
  0xbb   : > { %v286_v55 = vmul.f32 %v760_v50, %v760_v50 }
  0xbc   : > { %299 = vadd.xlane.f32.xlu1 %v298_v54  ;;  %v301_v56 = vsel %vm182_vm0, %v285_v53, 0.0  ;;  %v769_v57 = vsub.f32 %v686_v14, %v271_v52  ;;  %v772_v10 = vsub.f32 %v684_v13, %v272_v51  ;;  %v413_v13 = vld [vmem:[%s873_s2 + $0x10] sm:$0xf]  ;;  %v412_v14 = vld [vmem:[%s873_s2 + $0xc] sm:$0xf]  ;;  %v802_v8 = vpop.permute.xlu1 %439 }
  0xbd   : > { %302 = vadd.xlane.f32.xlu0 %v301_v56  ;;  %v304_v58 = vsel %vm182_vm0, %v286_v55, 0.0 }
  0xbe   : > { %v287_v9 = vmul.f32 %v769_v57, %v769_v57  ;;  %v288_v59 = vmul.f32 %v772_v10, %v772_v10 }
  0xc0   : > { %305 = vadd.xlane.f32.xlu1 %v304_v58  ;;  %v307_v60 = vsel %vm182_vm0, %v287_v9, 0.0  ;;  %v310_v61 = vsel %vm182_vm0, %v288_v59, 0.0  ;;  %v804_v11 = vpop.permute.xlu1 %444 }
  0xc1   : > { %308 = vadd.xlane.f32.xlu0 %v307_v60 }
  0xc4   : > { %311 = vadd.xlane.f32.xlu1 %v310_v61  ;;  %v806_v12 = vpop.permute.xlu1 %449 }
  0xc8   : > { %v808_v15 = vpop.permute.xlu1 %454 }
  0xcc   : > { %v812_v17 = vpop.permute.xlu1 %467 }
  0xd0   : > { %v816_v19 = vpop.permute.xlu1 %477 }
  0xd5   : > { %487 = vperm.xlu1 %598, %v413_v13  }
  0xd7   : > { %482 = vperm.xlu0 %597, %v412_v14  }
  0xd9   : > { %497 = vperm.xlu1 %598, %v415_v62  }
  0xdb   : > { %492 = vperm.xlu0 %597, %v414_v63  }
  0xdf   : > { %502 = vperm.xlu0 %597, %v416_v0  }
 0x141   : > { %v291_v20 = vpop.xlane.xlu0 %290 }
 0x142   : > { %v313_v21 = vsel %vm207_vm1, %v291_v20, 0.0 }
 0x143   : > { %v314_v24 = vrot.slane %v313_v21, 4 }
 0x145   : > { %v315_v25 = vadd.f32 %v314_v24, %v313_v21  ;;  %v294_v26 = vpop.xlane.xlu1 %293  ;;  %v297_v27 = vpop.xlane.xlu0 %296 }
 0x146   : > { %v320_v28 = vsel %vm207_vm1, %v294_v26, 0.0  ;;  %v327_v29 = vsel %vm207_vm1, %v297_v27, 0.0 }
 0x147   : > { %v316_v30 = vrot.slane %v315_v25, 2  ;;  %v321_v31 = vrot.slane %v320_v28, 4  ;;  %v328_v32 = vrot.slane %v327_v29, 4 }
 0x149   : > { %v317_v33 = vadd.f32 %v316_v30, %v315_v25  ;;  %v322_v34 = vadd.f32 %v321_v31, %v320_v28  ;;  %v329_v35 = vadd.f32 %v328_v32, %v327_v29  ;;  %v300_v2 = vpop.xlane.xlu1 %299 }
 0x14a   : > { %v334_v37 = vsel %vm207_vm1, %v300_v2, 0.0  ;;  %v303_v38 = vpop.xlane.xlu0 %302 }
 0x14b   : > { %v318_v39 = vrot.slane %v317_v33, 1  ;;  %v323_v40 = vrot.slane %v322_v34, 2  ;;  %v330_v41 = vrot.slane %v329_v35, 2  ;;  %v335_v42 = vrot.slane %v334_v37, 4 }
 0x14c   : > { %v341_v43 = vsel %vm207_vm1, %v303_v38, 0.0 }
 0x14d   : > { %v319_v44 = vadd.f32 %v318_v39, %v317_v33  ;;  %v324_v45 = vadd.f32 %v323_v40, %v322_v34  ;;  %v331_v46 = vadd.f32 %v330_v41, %v329_v35  ;;  %v336_v6 = vadd.f32 %v335_v42, %v334_v37  ;;  %v306_v3 = vpop.xlane.xlu1 %305 }
 0x14e   : > { %v342_v47 = vrot.slane %v341_v43, 4  ;;  %v348_v48 = vsel %vm207_vm1, %v306_v3, 0.0  ;;  %v309_v51 = vpop.xlane.xlu0 %308 }
 0x14f   : > { %v369_v52 = vmul.f32 0.00390625, %v319_v44  ;;  %v325_v53 = vrot.slane %v324_v45, 1  ;;  %v332_v54 = vrot.slane %v331_v46, 1  ;;  %v337_v55 = vrot.slane %v336_v6, 2 }
 0x150   : > { %v343_v56 = vadd.f32 %v342_v47, %v341_v43  ;;  %v349_v9 = vrot.slane %v348_v48, 4  ;;  %v355_v58 = vsel %vm207_vm1, %v309_v51, 0.0 }
 0x151   : > { %v377_v59 = vadd.f32 1e-05, %v369_v52  ;;  %v326_v60 = vadd.f32 %v325_v53, %v324_v45  ;;  %v333_v61 = vadd.f32 %v332_v54, %v331_v46  ;;  %v338_v13 = vadd.f32 %v337_v55, %v336_v6  ;;  %v312_v14 = vpop.xlane.xlu1 %311 }
 0x152   : > { %v344_v62 = vrot.slane %v343_v56, 2  ;;  %v350_v63 = vadd.f32 %v349_v9, %v348_v48  ;;  %v356_v0 = vrot.slane %v355_v58, 4  ;;  %v362_v20 = vsel %vm207_vm1, %v312_v14, 0.0 }
 0x153   : > { %599 = vrsqrt.f32 %v377_v59  ;;  %v370_v21 = vmul.f32 0.00390625, %v326_v60  ;;  %v371_v24 = vmul.f32 0.00390625, %v333_v61  ;;  %v339_v25 = vrot.slane %v338_v13, 1 }
 0x154   : > { %v345_v26 = vadd.f32 %v344_v62, %v343_v56  ;;  %v351_v27 = vrot.slane %v350_v63, 2  ;;  %v357_v28 = vadd.f32 %v356_v0, %v355_v58  ;;  %v363_v29 = vrot.slane %v362_v20, 4 }
 0x155   : > { %v378_v30 = vadd.f32 1e-05, %v370_v21  ;;  %v379_v31 = vadd.f32 1e-05, %v371_v24  ;;  %v340_v32 = vadd.f32 %v339_v25, %v338_v13  ;;  %v488_v24 = vpop.permute.xlu1 %487 }
 0x156   : > { %v346_v33 = vrot.slane %v345_v26, 1  ;;  %v352_v34 = vadd.f32 %v351_v27, %v350_v63  ;;  %v358_v35 = vrot.slane %v357_v28, 2  ;;  %v364_v2 = vadd.f32 %v363_v29, %v362_v20  ;;  %v483_v20 = vpop.permute.xlu0 %482 }
 0x157   : > { %601 = vrsqrt.f32 %v378_v30  ;;  %v372_v37 = vmul.f32 0.00390625, %v340_v32 }
 0x158   : > { %603 = vrsqrt.f32 %v379_v31  ;;  %v347_v38 = vadd.f32 %v346_v33, %v345_v26  ;;  %v353_v39 = vrot.slane %v352_v34, 1  ;;  %v359_v40 = vadd.f32 %v358_v35, %v357_v28 }
 0x159   : > { %v380_v41 = vadd.f32 1e-05, %v372_v37  ;;  %v365_v42 = vrot.slane %v364_v2, 2 }
 0x15a   : > { %v373_v43 = vmul.f32 0.00390625, %v347_v38  ;;  %v354_v44 = vadd.f32 %v353_v39, %v352_v34  ;;  %v360_v45 = vrot.slane %v359_v40, 1  ;;  %v493_v28 = vpop.permute.xlu0 %492 }
 0x15b   : > { %605 = vrsqrt.f32 %v380_v41  ;;  %v366_v46 = vadd.f32 %v365_v42, %v364_v2 }
 0x15c   : > { %v381_v6 = vadd.f32 1e-05, %v373_v43  ;;  %v374_v3 = vmul.f32 0.00390625, %v354_v44  ;;  %v361_v47 = vadd.f32 %v360_v45, %v359_v40 }
 0x15d   : > { %v600_v48 = vpop.eup %599  ;;  %v367_v51 = vrot.slane %v366_v46, 1 }
 0x15e   : > { %v393_v52 = vmul.f32 %v600_v48, %v734_v22  ;;  %607 = vrsqrt.f32 %v381_v6  ;;  %v382_v53 = vadd.f32 1e-05, %v374_v3  ;;  %v375_v54 = vmul.f32 0.00390625, %v361_v47 }
 0x15f   : > { %v368_v55 = vadd.f32 %v367_v51, %v366_v46 }
 0x160   : > { %v457_v56 = vmul.f32 %v810_v16, %v393_v52  ;;  %609 = vrsqrt.f32 %v382_v53  ;;  %v383_v9 = vadd.f32 1e-05, %v375_v54 }
 0x161   : > { %v602_v58 = vpop.eup %601  ;;  %v376_v59 = vmul.f32 0.00390625, %v368_v55 }
 0x162   : > { %v604_v60 = vpop.eup %603  ;;  %v505_v22 = vadd.f32 %v812_v17, %v457_v56  ;;  %v394_v61 = vmul.f32 %v602_v58, %v745_v1  ;;  %611 = vrsqrt.f32 %v383_v9 }
 0x163   : > { %v395_v16 = vmul.f32 %v604_v60, %v737_v23  ;;  %v384_v13 = vadd.f32 1e-05, %v376_v59 }
 0x164   : > { %513 = vst.msk [vmem:[%s833_s29] sm:$0xf] %vm182_vm0, %v505_v22  ;;  %v458_v14 = vmul.f32 %v796_v4, %v394_v61 }
 0x165   : > { %v606_v62 = vpop.eup %605  ;;  %v459_v63 = vmul.f32 %v798_v5, %v395_v16  ;;  %613 = vrsqrt.f32 %v384_v13 }
 0x166   : > { %v506_v0 = vadd.f32 %v814_v18, %v458_v14  ;;  %v396_v17 = vmul.f32 %v606_v62, %v748_v36 }
 0x167   : > { %v507_v1 = vadd.f32 %v816_v19, %v459_v63 }
 0x168   : > { %v608_v21 = vpop.eup %607  ;;  %514 = vst.msk [vmem:[%s833_s29 + $0x4] sm:$0xf] %vm182_vm0, %v506_v0  ;;  %v460_v23 = vmul.f32 %v800_v7, %v396_v17 }
 0x169   : > { %515 = vst.msk [vmem:[%s833_s29 + $0x8] sm:$0xf] %vm182_vm0, %v507_v1  ;;  %v397_v4 = vmul.f32 %v608_v21, %v757_v49 }
 0x16a   : > { %v610_v5 = vpop.eup %609  ;;  %v508_v25 = vadd.f32 %v483_v20, %v460_v23 }
 0x16b   : > { %v461_v18 = vmul.f32 %v802_v8, %v397_v4  ;;  %v398_v36 = vmul.f32 %v610_v5, %v760_v50  ;;  %v498_v8 = vpop.permute.xlu1 %497 }
 0x16c   : > { %v612_v19 = vpop.eup %611  ;;  %516 = vst.msk [vmem:[%s833_s29 + $0xc] sm:$0xf] %vm182_vm0, %v508_v25 }
 0x16d   : > { %v509_v26 = vadd.f32 %v488_v24, %v461_v18  ;;  %v399_v7 = vmul.f32 %v612_v19, %v769_v57  ;;  %v462_v27 = vmul.f32 %v804_v11, %v398_v36  ;;  %v503_v57 = vpop.permute.xlu0 %502 }
 0x16f   : > { %v614_v49 = vpop.eup %613  ;;  %517 = vst.msk [vmem:[%s833_s29 + $0x10] sm:$0xf] %vm182_vm0, %v509_v26  ;;  %v463_v29 = vmul.f32 %v806_v12, %v399_v7  ;;  %v510_v30 = vadd.f32 %v493_v28, %v462_v27 }
 0x170   : > { %v400_v50 = vmul.f32 %v614_v49, %v772_v10 }
 0x171   : > { %v511_v31 = vadd.f32 %v498_v8, %v463_v29  ;;  %518 = vst.msk [vmem:[%s833_s29 + $0x14] sm:$0xf] %vm182_vm0, %v510_v30 }
 0x172   : > { %v464_v32 = vmul.f32 %v808_v15, %v400_v50 }
 0x173   : > { %519 = vst.msk [vmem:[%s833_s29 + $0x18] sm:$0xf] %vm182_vm0, %v511_v31 }
 0x174   : > { %v512_v33 = vadd.f32 %v503_v57, %v464_v32 }
 0x176   : > { %520 = vst.msk [vmem:[%s833_s29 + $0x1c] sm:$0xf] %vm182_vm0, %v512_v33 }
 0x177 PF: > { %s13_s12 = sadd.s32 1, %s621_s12  }
 0x178   : > { %p10_p4 = scmp.ge.s32.totalorder %s13_s12, 4  }
 0x17a   :  { %12 = sbr.rel (!%p10_p4) target bundleno = 1 (0x1), region = 62 }

// kernel: self_attention_forward.7
= control target key start
LH: loop header
LB: loop body
LE: loop exit
PB: predicated region body
PF: predicated region fallthrough
CT: control target
= control target key end

     0   :  { %s417_s12 = smov 0   ;;  %s461_s0 = inlined_call_operand.vmem [shape: f32[128,32], index: 0, kind: input, shape index: {}]   ;;  %s462_s1 = inlined_call_operand.vmem [shape: f32[32,96], index: 1, kind: input, shape index: {}]   ;;  %s463_s2 = inlined_call_operand.vmem [shape: f32[1,96], index: 2, kind: input, shape index: {}]   ;;  %s464_s3 = inlined_call_operand.vmem [shape: f32[128,96], index: 3, kind: output, shape index: {}]  }
   0x1 LB: > { %s343_s13 = sadd.s32 4294967295, %s395_s12   ;;  %p347_p0 = scmp.ge.s32.totalorder %s395_s12, 1  ;;  %s395_s12 = sphi %s417_s12, %s13_s12  }
   0x2   : > { %p138_p1 = scmp.lt.s32.totalorder %s395_s12, 3 }
   0x4   : > { %p139_p2 = pnand %p347_p0, %p138_p1 }
   0x5   : > { %v187_v0 = vld [vmem:[%s462_s1] sm:$0xff] (!%p139_p2)  ;;  %v188_v1 = vld [vmem:[%s462_s1 + $0x8] sm:$0xff] (!%p139_p2)  ;;  %v189_v2 = vld [vmem:[%s462_s1 + $0x10] sm:$0xff] (!%p139_p2)  ;;  %s348_s20 = sshll.u32 (!%p139_p2), %s343_s13, 3  ;;  %vm200_vm0 = vcmask (!%p139_p2), 261120   ;;  %vm278_vm1 = vcmask (!%p139_p2), 785408  }
   0x6   : > { %142 = sbr.rel (%p139_p2) target bundleno = 239 (0xef), region = 32  ;;  %v191_v3 = vpack.c.bf16 (!%p139_p2), %v188_v1, %v187_v0  ;;  %v190_v4 = vld [vmem:[%s462_s1 + $0x18] sm:$0xff] (!%p139_p2)  ;;  %p163_p3 = scmp.lt.s32.totalorder (!%p139_p2), %s348_s20, 15  ;;  %v352_v18 = vld [vmem:[%s463_s2] ss:$0 sm:$0xff] (!%p139_p2) }
   0x7   : > { %v192_v5 = vpack.c.bf16 (!%p139_p2), %v190_v4, %v189_v2 }
   0x8   : > { %365 = vmatprep.subr.bf16.mxu0 (!%p139_p2), %v191_v3  ;;  %377 = vmatprep.subr.bf16.mxu1 (!%p139_p2), %v191_v3 }
   0x9   : > { %366 = vmatpush3.bf16.msra.mxu0 (!%p139_p2), %v191_v3  ;;  %379 = vmatpush3.bf16.msra.mxu1 (!%p139_p2), %v191_v3 }
   0xa   : > { %367 = vmatprep.subr.bf16.mxu0 (!%p139_p2), %v192_v5  ;;  %378 = vmatprep.subr.bf16.mxu1 (!%p139_p2), %v192_v5 }
   0xd   : > { %s466_s20 = smov (!%p163_p3, %s348_s20), 15  ;;  %368 = vmatpush3.bf16.msra.mxu0 %v192_v5  ;;  %380 = vmatpush3.bf16.msra.mxu1 %v192_v5 }
   0xe   : > { %s349_s23 = sshll.u32 %s466_s20, 3 }
   0xf   : > { %s166_s26 = scalar_lea.vmem %s461_s0, %s349_s23  ;;  %s172_s4 = scalar_lea.vmem %s464_s3, %s349_s23 }
  0x10   : > { %v175_v6 = vld [vmem:[%s166_s26] sm:$0xff]  ;;  %v176_v7 = vld [vmem:[%s166_s26 + $0x8] sm:$0xff]  ;;  %v177_v11 = vld [vmem:[%s166_s26 + $0x10] sm:$0xff] }
  0x11   : > { %v179_v8 = vld [vmem:[%s166_s26 + $0x20] sm:$0xff]  ;;  %v183_v9 = vpack.c.bf16 %v176_v7, %v175_v6  ;;  %v180_v10 = vld [vmem:[%s166_s26 + $0x28] sm:$0xff]  ;;  %v178_v12 = vld [vmem:[%s166_s26 + $0x18] sm:$0xff] }
  0x12   : > { %v185_v13 = vpack.c.bf16 %v180_v10, %v179_v8  ;;  %v184_v14 = vpack.c.bf16 %v178_v12, %v177_v11  ;;  %v181_v15 = vld [vmem:[%s166_s26 + $0x30] sm:$0xff]  ;;  %v182_v16 = vld [vmem:[%s166_s26 + $0x38] sm:$0xff] }
  0x13   : > { %369 = vmatprep.mubr.msk.bf16.mxu0 %vm200_vm0, %v183_v9  ;;  %v186_v17 = vpack.c.bf16 %v182_v16, %v181_v15 }
  0x14   : > { %373 = vmatprep.mubr.msk.bf16.mxu1 %vm200_vm0, %v185_v13  ;;  %370 = vmatmul.mubr.msk.bf16.vlgmr.msra.gmra.mrb[0].mxu0 %vm200_vm0, %v184_v14 }
  0x15   : > { %374 = vmatmul.mubr.msk.bf16.vlgmr.msra.gmra.mrb[0].mxu1 %vm200_vm0, %v186_v17 }
  0xe7   : > { %v371_v19 = vpop.f32.mrb[0].mxu0 }
  0xe8   : > { %v256_v20 = vadd.f32 %v371_v19, %v352_v18  ;;  %v375_v21 = vpop.f32.mrb[0].mxu1  ;;  %v247_v22 = vpop.f32.mrb[1].mxu0 }
  0xe9   : > { %v272_v23 = vadd.f32 %v375_v21, %v352_v18  ;;  %v248_v24 = vadd.f32 %v352_v18, %v247_v22  ;;  %v263_v25 = vpop.f32.mrb[1].mxu1  ;;  %v372_v26 = vpop.f32.mrb[2].mxu0 }
  0xea   : > { %281 = vst.msk [vmem:[%s172_s4 + $0x10] sm:$0xff] %vm278_vm1, %v256_v20  ;;  %v264_v27 = vadd.f32 %v352_v18, %v263_v25  ;;  %v259_v28 = vadd.f32 %v372_v26, %v352_v18  ;;  %v376_v29 = vpop.f32.mrb[2].mxu1  ;;  %v250_v30 = vpop.f32.mrb[3].mxu0 }
  0xeb   : > { %285 = vst.msk [vmem:[%s172_s4 + $0x30] sm:$0xff] %vm278_vm1, %v272_v23  ;;  %279 = vst.msk [vmem:[%s172_s4] sm:$0xff] %vm278_vm1, %v248_v24  ;;  %v275_v31 = vadd.f32 %v376_v29, %v352_v18  ;;  %v251_v32 = vadd.f32 %v352_v18, %v250_v30  ;;  %v266_v33 = vpop.f32.mrb[3].mxu1 }
  0xec   : > { %283 = vst.msk [vmem:[%s172_s4 + $0x20] sm:$0xff] %vm278_vm1, %v264_v27  ;;  %282 = vst.msk [vmem:[%s172_s4 + $0x18] sm:$0xff] %vm278_vm1, %v259_v28  ;;  %v267_v34 = vadd.f32 %v352_v18, %v266_v33 }
  0xed   : > { %286 = vst.msk [vmem:[%s172_s4 + $0x38] sm:$0xff] %vm278_vm1, %v275_v31  ;;  %280 = vst.msk [vmem:[%s172_s4 + $0x8] sm:$0xff] %vm278_vm1, %v251_v32 }
  0xee   : > { %284 = vst.msk [vmem:[%s172_s4 + $0x28] sm:$0xff] %vm278_vm1, %v267_v34 }
  0xef PF: > { %s13_s12 = sadd.s32 1, %s395_s12  }
  0xf0   : > { %p10_p4 = scmp.ge.s32.totalorder %s13_s12, 4  }
  0xf2   :  { %12 = sbr.rel (!%p10_p4) target bundleno = 1 (0x1), region = 62 }

// kernel: self_attention_forward.8
= control target key start
LH: loop header
LB: loop body
LE: loop exit
PB: predicated region body
PF: predicated region fallthrough
CT: control target
= control target key end

     0   :  { %s675_s12 = smov 0   ;;  %s677_s13 = smov 0   ;;  %s761_s0 = inlined_call_operand.vmem [shape: f32[3,2,8,256], index: 0, kind: input, shape index: {}, may-alias: {0,1,2}]   ;;  %s762_s1 = inlined_call_operand.vmem [shape: f32[3,2,8,256], index: 1, kind: input, shape index: {}, may-alias: {0,1,2}]   ;;  %s763_s2 = inlined_call_operand.vmem [shape: f32[3,2,8,256], index: 2, kind: input, shape index: {}, may-alias: {0,1,2}]   ;;  %s764_s3 = inlined_call_operand.vmem [shape: f32[2,8,256], index: 3, kind: output, shape index: {}]  }
   0x1   :  { %s679_s14 = smov 0  }
   0x2 LB: > { %s572_s15 = sadd.s32 4294967295, %s653_s14   ;;  %s692_s16 = sadd.s32 1, %s653_s14   ;;  %s653_s14 = sphi %s679_s14, %s769_s14   ;;  %s649_s13 = sphi %s677_s13, %s768_s13   ;;  %s645_s12 = sphi %s675_s12, %s767_s12  }
   0x3   : > { %s17_s17 = ssub.s32 %s653_s14, %s692_s16  ;;  %s20_s18 = sadd.s32 1, %s649_s13 }
   0x4   : > { %p18_p0 = scmp.eq.s32.totalorder %s17_s17, 0  ;;  %p27_p1 = scmp.ne.s32.totalorder %s649_s13, %s645_s12 }
   0x5   : > { %p28_p2 = scmp.eq.s32.totalorder %s653_s14, 0  ;;  %p109_p3 = scmp.eq.s32.totalorder %s572_s15, 1 }
   0x6   : > { %s703_s19 = scalar_select %p18_p0, %s649_s13, %s20_s18  }
   0x7   : > { %p705_p4 = por %p28_p2, %p27_p1  ;;  %p709_p5 = por %p109_p3, %p27_p1 }
   0x8   : > { %p575_p6 = scmp.ge.s32.totalorder %s653_s14, 2 }
   0xa   : > { %131 = sbr.rel (%p575_p6) target bundleno = 38 (0x26), region = 16 }
  0x11   : > { %134 = sbr.rel (!%p705_p4) target bundleno = 24 (0x18), region = 20  ;;  %s136_s22 = sand.u32 (%p705_p4), 1, %s649_s13  }
  0x12   : > { %s577_s23 = sshll.u32 (%p705_p4), %s653_s14, 3  ;;  %s576_s24 = sshll.u32 (%p705_p4), %s136_s22, 4 }
  0x13   : > { %s140_s27 = scalar_lea.vmem (%p705_p4), %s761_s0, %s577_s23  ;;  %s138_s28 = scalar_lea.vmem (%p705_p4), [#allocation2], %s576_s24 }
  0x14   : > { %v170_v0 = vld [vmem:[%s140_s27] sm:$0xff] (%p705_p4)  ;;  %v172_v1 = vld [vmem:[%s140_s27 + $0x10] sm:$0xff] (%p705_p4) }
  0x15   : > { %171 = vst [vmem:[%s138_s28] sm:$0xff] (%p705_p4), %v170_v0  ;;  %173 = vst [vmem:[%s138_s28 + $0x8] sm:$0xff] (%p705_p4), %v172_v1 }
  0x18 PF: > { %179 = sbr.rel (!%p705_p4) target bundleno = 31 (0x1f), region = 58  ;;  %s181_s29 = sand.u32 (%p705_p4), 1, %s649_s13  }
  0x19   : > { %s579_s30 = sshll.u32 (%p705_p4), %s653_s14, 3  ;;  %s578_s4 = sshll.u32 (%p705_p4), %s181_s29, 4 }
  0x1a   : > { %s497_s7 = scalar_lea.vmem (%p705_p4), %s762_s1, %s579_s30  ;;  %s183_s8 = scalar_lea.vmem (%p705_p4), [#allocation3], %s578_s4 }
  0x1b   : > { %v580_v2 = vld [vmem:[%s497_s7 + $0x20] sm:$0xff] (%p705_p4)  ;;  %v581_v3 = vld [vmem:[%s497_s7 + $0x30] sm:$0xff] (%p705_p4) }
  0x1c   : > { %217 = vst [vmem:[%s183_s8] sm:$0xff] (%p705_p4), %v580_v2  ;;  %219 = vst [vmem:[%s183_s8 + $0x8] sm:$0xff] (%p705_p4), %v581_v3 }
  0x1f PF: > { %225 = sbr.rel (!%p705_p4) target bundleno = 38 (0x26), region = 96  ;;  %s227_s9 = sand.u32 (%p705_p4), 1, %s649_s13  }
  0x20   : > { %s583_s10 = sshll.u32 (%p705_p4), %s653_s14, 3  ;;  %s582_s11 = sshll.u32 (%p705_p4), %s227_s9, 4 }
  0x21   : > { %s502_s22 = scalar_lea.vmem (%p705_p4), %s763_s2, %s583_s10  ;;  %s229_s23 = scalar_lea.vmem (%p705_p4), [#allocation4], %s582_s11 }
  0x22   : > { %v584_v4 = vld [vmem:[%s502_s22 + $0x40] sm:$0xff] (%p705_p4)  ;;  %v585_v5 = vld [vmem:[%s502_s22 + $0x50] sm:$0xff] (%p705_p4) }
  0x23   : > { %263 = vst [vmem:[%s229_s23] sm:$0xff] (%p705_p4), %v584_v4  ;;  %265 = vst [vmem:[%s229_s23 + $0x8] sm:$0xff] (%p705_p4), %v585_v5 }
  0x26 PF: > { %p586_p7 = scmp.ge.s32.totalorder %s653_s14, 1  ;;  %p270_p8 = scmp.lt.s32.totalorder %s653_s14, 3 }
  0x28   : > { %p271_p9 = pnand %p586_p7, %p270_p8 }
  0x29   : > { %s277_s20 = sand.u32 (!%p271_p9), 1, %s645_s12   ;;  %vm376_vm0 = vcmask (!%p271_p9), 1041409   ;;  %vm382_vm1 = vcmask (!%p271_p9), 1041408   ;;  %v399_v60 = vlaneseq (!%p271_p9) }
  0x2a   : > { %274 = sbr.rel (%p271_p9) target bundleno = 121 (0x79), region = 134  ;;  %s738_s24 = sshll.u32 (!%p271_p9), %s277_s20, 4 }
  0x2b   : > { %s279_s25 = scalar_lea.vmem (!%p271_p9), [#allocation2], %s738_s24  ;;  %s286_s26 = scalar_lea.vmem (!%p271_p9), [#allocation3], %s738_s24  ;;  %v400_v2 = vshrl.u32 (!%p271_p9), %v399_v60, 7 }
  0x2c   : > { %v321_v6 = vld [vmem:[%s279_s25] sm:$0xff] (!%p271_p9)  ;;  %v322_v7 = vld [vmem:[%s279_s25 + $0x8] sm:$0xff] (!%p271_p9)  ;;  %s293_s12 = scalar_lea.vmem (!%p271_p9), [#allocation4], %s738_s24  ;;  %s320_s27 = scalar_lea.vmem (!%p271_p9), [#allocation5], %s738_s24 }
  0x2d   : > { %v325_v8 = vld [vmem:[%s286_s26] sm:$0xff] (!%p271_p9)  ;;  %v323_v9 = vmul.f32 (!%p271_p9), 0.35355338, %v321_v6  ;;  %v324_v10 = vmul.f32 (!%p271_p9), 0.35355338, %v322_v7  ;;  %v326_v11 = vld [vmem:[%s286_s26 + $0x8] sm:$0xff] (!%p271_p9) }
  0x2e   : > { %v401_v7 = vsub.s32 (!%p271_p9), 0, %v400_v2 }
  0x2f   : > { %v329_v12 = vmul.f32 (!%p271_p9), %v325_v8, %v323_v9  ;;  %v330_v13 = vmul.f32 (!%p271_p9), %v326_v11, %v323_v9  ;;  %v331_v14 = vmul.f32 (!%p271_p9), %v325_v8, %v324_v10  ;;  %v332_v15 = vmul.f32 (!%p271_p9), %v326_v11, %v324_v10 }
  0x31   : > { %v333_v16 = vrot.slane %v329_v12, 4  ;;  %v339_v17 = vrot.slane %v330_v13, 4  ;;  %v345_v18 = vrot.slane %v331_v14, 4  ;;  %v351_v19 = vrot.slane %v332_v15, 4  ;;  %s592_s28 = sshll.u32 (%p709_p5), %s572_s15, 3 }
  0x32   : > { %s441_s4 = scalar_lea.vmem (%p709_p5), %s764_s3, %s592_s28 }
  0x33   : > { %v334_v20 = vadd.f32 %v333_v16, %v329_v12  ;;  %v340_v21 = vadd.f32 %v339_v17, %v330_v13  ;;  %v346_v22 = vadd.f32 %v345_v18, %v331_v14  ;;  %v352_v23 = vadd.f32 %v351_v19, %v332_v15  ;;  %v327_v13 = vld [vmem:[%s293_s12] sm:$0xff]  ;;  %v328_v14 = vld [vmem:[%s293_s12 + $0x8] sm:$0xff] }
  0x35   : > { %v335_v24 = vrot.slane %v334_v20, 2  ;;  %v341_v25 = vrot.slane %v340_v21, 2  ;;  %v347_v26 = vrot.slane %v346_v22, 2  ;;  %v353_v27 = vrot.slane %v352_v23, 2 }
  0x37   : > { %v336_v28 = vadd.f32 %v335_v24, %v334_v20  ;;  %v342_v29 = vadd.f32 %v341_v25, %v340_v21  ;;  %v348_v30 = vadd.f32 %v347_v26, %v346_v22  ;;  %v354_v31 = vadd.f32 %v353_v27, %v352_v23 }
  0x39   : > { %v337_v32 = vrot.slane %v336_v28, 1  ;;  %v343_v33 = vrot.slane %v342_v29, 1  ;;  %v349_v34 = vrot.slane %v348_v30, 1  ;;  %v355_v35 = vrot.slane %v354_v31, 1 }
  0x3b   : > { %v338_v36 = vadd.f32 %v337_v32, %v336_v28  ;;  %v344_v37 = vadd.f32 %v343_v33, %v342_v29  ;;  %v350_v38 = vadd.f32 %v349_v34, %v348_v30  ;;  %v356_v39 = vadd.f32 %v355_v35, %v354_v31 }
  0x3d   : > { %v357_v40 = vmax.f32 %v338_v36, %v344_v37  ;;  %v358_v41 = vmax.f32 %v350_v38, %v356_v39 }
  0x3f   : > { %v359_v42 = vsub.f32 %v338_v36, %v357_v40  ;;  %v360_v43 = vsub.f32 %v344_v37, %v357_v40  ;;  %v361_v44 = vsub.f32 %v350_v38, %v358_v41  ;;  %v362_v45 = vsub.f32 %v356_v39, %v358_v41 }
  0x41   : > { %v363_v46 = vmul.f32 1.442695, %v359_v42  ;;  %v365_v47 = vmul.f32 1.442695, %v360_v43  ;;  %v367_v48 = vmul.f32 1.442695, %v361_v44 }
  0x42   : > { %v369_v49 = vmul.f32 1.442695, %v362_v45 }
  0x43   : > { %619 = vpow2.f32 %v363_v46 }
  0x44   : > { %621 = vpow2.f32 %v365_v47 }
  0x45   : > { %623 = vpow2.f32 %v367_v48 }
  0x46   : > { %625 = vpow2.f32 %v369_v49 }
  0x4d   : > { %v620_v50 = vpop.eup %619 }
  0x4e   : > { %v622_v51 = vpop.eup %621  ;;  %v402_v11 = vrot.slane %v620_v50, %v401_v7 }
  0x4f   : > { %v624_v52 = vpop.eup %623  ;;  %v375_v53 = vrot.slane %v622_v51, 7  ;;  %v406_v12 = vrot.slane %v622_v51, %v401_v7 }
  0x50   : > { %v626_v54 = vpop.eup %625  ;;  %v410_v15 = vrot.slane %v624_v52, %v401_v7  ;;  %v415_v17 = vmul.f32 %v402_v11, %v327_v13 }
  0x51   : > { %v377_v55 = vsel %vm376_vm0, %v375_v53, %v620_v50  ;;  %v378_v56 = vrot.slane %v626_v54, 7  ;;  %v414_v16 = vrot.slane %v626_v54, %v401_v7  ;;  %v416_v18 = vmul.f32 %v406_v12, %v328_v14 }
  0x52   : > { %v383_v57 = vsel %vm382_vm1, %v377_v55, 0.0  ;;  %v417_v19 = vmul.f32 %v410_v15, %v327_v13 }
  0x53   : > { %v384_v58 = vrot.slane %v383_v57, 4  ;;  %v379_v59 = vsel %vm376_vm0, %v378_v56, %v624_v52  ;;  %v418_v20 = vmul.f32 %v414_v16, %v328_v14  ;;  %v419_v21 = vadd.f32 %v416_v18, %v415_v17 }
  0x54   : > { %v390_v61 = vsel %vm382_vm1, %v379_v59, 0.0 }
  0x55   : > { %v385_v62 = vadd.f32 %v384_v58, %v383_v57  ;;  %v391_v63 = vrot.slane %v390_v61, 4  ;;  %v420_v24 = vadd.f32 %v418_v20, %v417_v19 }
  0x57   : > { %v386_v0 = vrot.slane %v385_v62, 2  ;;  %v392_v1 = vadd.f32 %v391_v63, %v390_v61 }
  0x59   : > { %v387_v3 = vadd.f32 %v386_v0, %v385_v62  ;;  %v393_v4 = vrot.slane %v392_v1, 2 }
  0x5b   : > { %v388_v5 = vrot.slane %v387_v3, 1  ;;  %v394_v6 = vadd.f32 %v393_v4, %v392_v1 }
  0x5d   : > { %v389_v8 = vadd.f32 %v388_v5, %v387_v3  ;;  %v395_v9 = vrot.slane %v394_v6, 1 }
  0x5f   : > { %627 = vrcp.f32 %v389_v8  ;;  %v396_v10 = vadd.f32 %v395_v9, %v394_v6 }
  0x61   : > { %629 = vrcp.f32 %v396_v10 }
  0x69   : > { %v628_v22 = vpop.eup %627 }
  0x6a   : > { %v424_v23 = vrot.slane %v628_v22, %v401_v7  ;;  %439 = sbr.rel (!%p709_p5) target bundleno = 121 (0x79), region = 150 }
  0x6b   : > { %v630_v25 = vpop.eup %629 }
  0x6c   : > { %v429_v26 = vmul.f32 %v424_v23, %v419_v21  ;;  %v428_v27 = vrot.slane %v630_v25, %v401_v7 }
  0x6e   : > { %431 = vst [vmem:[%s320_s27] sm:$0xff] %v429_v26  ;;  %v430_v28 = vmul.f32 %v428_v27, %v420_v24 }
  0x70   : > { %432 = vst [vmem:[%s320_s27 + $0x8] sm:$0xff] %v430_v28 }
  0x75   : > { %v471_v29 = vld [vmem:[%s320_s27] sm:$0xff] }
  0x76   : > { %472 = vst [vmem:[%s441_s4] sm:$0xff] %v471_v29 }
  0x77   : > { %v473_v30 = vld [vmem:[%s320_s27 + $0x8] sm:$0xff] }
  0x78   : > { %474 = vst [vmem:[%s441_s4 + $0x10] sm:$0xff] %v473_v30 }
  0x79 PF: > { %p10_p10 = scmp.ge.s32.totalorder %s692_s16, 4   ;;  %s767_s12 = smov %s649_s13 }
  0x7a   : > { %s768_s13 = smov %s703_s19  ;;  %s769_s14 = smov %s692_s16 }
  0x7b   :  { %12 = sbr.rel (!%p10_p10) target bundleno = 2 (0x2), region = 235 }

// kernel: self_attention_forward.9
= control target key start
LH: loop header
LB: loop body
LE: loop exit
PB: predicated region body
PF: predicated region fallthrough
CT: control target
= control target key end

     0   :  { %s416_s12 = smov 0   ;;  %s460_s0 = inlined_call_operand.vmem [shape: f32[128,32], index: 0, kind: input, shape index: {}]   ;;  %s461_s1 = inlined_call_operand.vmem [shape: f32[32,32], index: 1, kind: input, shape index: {}]   ;;  %s462_s2 = inlined_call_operand.vmem [shape: f32[1,32], index: 2, kind: input, shape index: {}]   ;;  %s463_s3 = inlined_call_operand.vmem [shape: f32[128,32], index: 3, kind: output, shape index: {}]  }
   0x1 LB: > { %s342_s13 = sadd.s32 4294967295, %s394_s12   ;;  %p346_p0 = scmp.ge.s32.totalorder %s394_s12, 1  ;;  %s394_s12 = sphi %s416_s12, %s13_s12  }
   0x2   : > { %p138_p1 = scmp.lt.s32.totalorder %s394_s12, 3 }
   0x4   : > { %p139_p2 = pnand %p346_p0, %p138_p1 }
   0x5   : > { %v187_v0 = vld [vmem:[%s461_s1] sm:$0xff] (!%p139_p2)  ;;  %v188_v1 = vld [vmem:[%s461_s1 + $0x8] sm:$0xff] (!%p139_p2)  ;;  %v189_v2 = vld [vmem:[%s461_s1 + $0x10] sm:$0xff] (!%p139_p2)  ;;  %s347_s20 = sshll.u32 (!%p139_p2), %s342_s13, 3  ;;  %vm200_vm0 = vcmask (!%p139_p2), 261120  }
   0x6   : > { %142 = sbr.rel (%p139_p2) target bundleno = 239 (0xef), region = 32  ;;  %v191_v3 = vpack.c.bf16 (!%p139_p2), %v188_v1, %v187_v0  ;;  %v190_v4 = vld [vmem:[%s461_s1 + $0x18] sm:$0xff] (!%p139_p2)  ;;  %p163_p3 = scmp.lt.s32.totalorder (!%p139_p2), %s347_s20, 15  ;;  %v351_v18 = vld [vmem:[%s462_s2] ss:$0 sm:$0xff] (!%p139_p2) }
   0x7   : > { %v192_v5 = vpack.c.bf16 (!%p139_p2), %v190_v4, %v189_v2 }
   0x8   : > { %364 = vmatprep.subr.bf16.mxu0 (!%p139_p2), %v191_v3  ;;  %376 = vmatprep.subr.bf16.mxu1 (!%p139_p2), %v191_v3 }
   0x9   : > { %365 = vmatpush3.bf16.msra.mxu0 (!%p139_p2), %v191_v3  ;;  %378 = vmatpush3.bf16.msra.mxu1 (!%p139_p2), %v191_v3 }
   0xa   : > { %366 = vmatprep.subr.bf16.mxu0 (!%p139_p2), %v192_v5  ;;  %377 = vmatprep.subr.bf16.mxu1 (!%p139_p2), %v192_v5 }
   0xd   : > { %s465_s20 = smov (!%p163_p3, %s347_s20), 15  ;;  %367 = vmatpush3.bf16.msra.mxu0 %v192_v5  ;;  %379 = vmatpush3.bf16.msra.mxu1 %v192_v5 }
   0xe   : > { %s348_s23 = sshll.u32 %s465_s20, 3 }
   0xf   : > { %s166_s26 = scalar_lea.vmem %s460_s0, %s348_s23  ;;  %s172_s4 = scalar_lea.vmem %s463_s3, %s348_s23 }
  0x10   : > { %v175_v6 = vld [vmem:[%s166_s26] sm:$0xff]  ;;  %v176_v7 = vld [vmem:[%s166_s26 + $0x8] sm:$0xff]  ;;  %v177_v11 = vld [vmem:[%s166_s26 + $0x10] sm:$0xff] }
  0x11   : > { %v179_v8 = vld [vmem:[%s166_s26 + $0x20] sm:$0xff]  ;;  %v183_v9 = vpack.c.bf16 %v176_v7, %v175_v6  ;;  %v180_v10 = vld [vmem:[%s166_s26 + $0x28] sm:$0xff]  ;;  %v178_v12 = vld [vmem:[%s166_s26 + $0x18] sm:$0xff] }
  0x12   : > { %v185_v13 = vpack.c.bf16 %v180_v10, %v179_v8  ;;  %v184_v14 = vpack.c.bf16 %v178_v12, %v177_v11  ;;  %v181_v15 = vld [vmem:[%s166_s26 + $0x30] sm:$0xff]  ;;  %v182_v16 = vld [vmem:[%s166_s26 + $0x38] sm:$0xff] }
  0x13   : > { %368 = vmatprep.mubr.msk.bf16.mxu0 %vm200_vm0, %v183_v9  ;;  %v186_v17 = vpack.c.bf16 %v182_v16, %v181_v15 }
  0x14   : > { %372 = vmatprep.mubr.msk.bf16.mxu1 %vm200_vm0, %v185_v13  ;;  %369 = vmatmul.mubr.msk.bf16.vlgmr.msra.gmra.mrb[0].mxu0 %vm200_vm0, %v184_v14 }
  0x15   : > { %373 = vmatmul.mubr.msk.bf16.vlgmr.msra.gmra.mrb[0].mxu1 %vm200_vm0, %v186_v17 }
  0xe7   : > { %v370_v19 = vpop.f32.mrb[0].mxu0 }
  0xe8   : > { %v256_v20 = vadd.f32 %v370_v19, %v351_v18  ;;  %v374_v21 = vpop.f32.mrb[0].mxu1  ;;  %v247_v22 = vpop.f32.mrb[1].mxu0 }
  0xe9   : > { %v272_v23 = vadd.f32 %v374_v21, %v351_v18  ;;  %v248_v24 = vadd.f32 %v351_v18, %v247_v22  ;;  %v263_v25 = vpop.f32.mrb[1].mxu1  ;;  %v371_v26 = vpop.f32.mrb[2].mxu0 }
  0xea   : > { %280 = vst.msk [vmem:[%s172_s4 + $0x10] sm:$0xff] %vm200_vm0, %v256_v20  ;;  %v264_v27 = vadd.f32 %v351_v18, %v263_v25  ;;  %v259_v28 = vadd.f32 %v371_v26, %v351_v18  ;;  %v375_v29 = vpop.f32.mrb[2].mxu1  ;;  %v250_v30 = vpop.f32.mrb[3].mxu0 }
  0xeb   : > { %284 = vst.msk [vmem:[%s172_s4 + $0x30] sm:$0xff] %vm200_vm0, %v272_v23  ;;  %278 = vst.msk [vmem:[%s172_s4] sm:$0xff] %vm200_vm0, %v248_v24  ;;  %v275_v31 = vadd.f32 %v375_v29, %v351_v18  ;;  %v251_v32 = vadd.f32 %v351_v18, %v250_v30  ;;  %v266_v33 = vpop.f32.mrb[3].mxu1 }
  0xec   : > { %282 = vst.msk [vmem:[%s172_s4 + $0x20] sm:$0xff] %vm200_vm0, %v264_v27  ;;  %281 = vst.msk [vmem:[%s172_s4 + $0x18] sm:$0xff] %vm200_vm0, %v259_v28  ;;  %v267_v34 = vadd.f32 %v351_v18, %v266_v33 }
  0xed   : > { %285 = vst.msk [vmem:[%s172_s4 + $0x38] sm:$0xff] %vm200_vm0, %v275_v31  ;;  %279 = vst.msk [vmem:[%s172_s4 + $0x8] sm:$0xff] %vm200_vm0, %v251_v32 }
  0xee   : > { %283 = vst.msk [vmem:[%s172_s4 + $0x28] sm:$0xff] %vm200_vm0, %v267_v34 }
  0xef PF: > { %s13_s12 = sadd.s32 1, %s394_s12  }
  0xf0   : > { %p10_p4 = scmp.ge.s32.totalorder %s13_s12, 4  }
  0xf2   :  { %12 = sbr.rel (!%p10_p4) target bundleno = 1 (0x1), region = 62 }

// kernel: self_attention_forward.10
= control target key start
LH: loop header
LB: loop body
LE: loop exit
PB: predicated region body
PF: predicated region fallthrough
CT: control target
= control target key end

     0   :  { %s728_s15 = smov 0   ;;  %s956_s0 = inlined_call_operand.vmem [shape: f32[16,4,64], index: 0, kind: input, shape index: {}]   ;;  %s957_s1 = inlined_call_operand.vmem [shape: f32[16,4,64], index: 1, kind: input, shape index: {}]   ;;  %s958_s2 = inlined_call_operand.vmem [shape: f32[8,4,1], index: 2, kind: input, shape index: {}]   ;;  %s959_s3 = inlined_call_operand.vmem [shape: f32[8,4,1], index: 3, kind: input, shape index: {}]   ;;  %s960_s4 = inlined_call_operand.vmem [shape: f32[16,4,64], index: 4, kind: output, shape index: {}]  }
   0x1 LB: > { %s654_s16 = sadd.s32 4294967295, %s700_s15   ;;  %p658_p0 = scmp.ge.s32.totalorder %s700_s15, 1  ;;  %s700_s15 = sphi %s728_s15, %s14_s15  }
   0x2   : > { %p174_p1 = scmp.lt.s32.totalorder %s700_s15, 3 }
   0x4   : > { %p175_p2 = pnand %p658_p0, %p174_p1 }
   0x5   : > { %s659_s17 = sshll.u32 (!%p175_p2), %s654_s16, 3  ;;  %v702_v0 = vmov (!%p175_p2), 0   ;;  %vm247_vm0 = vcmask (!%p175_p2), 519168   ;;  %v467_v33 = vld [vmem:[%s958_s2 + $0x4] sm:$0xf] (!%p175_p2)  ;;  %vm272_vm1 = vcmask (!%p175_p2), 1043456  }
   0x6   : > { %178 = sbr.rel (%p175_p2) target bundleno = 378 (0x17a), region = 36  ;;  %p206_p3 = scmp.lt.s32.totalorder (!%p175_p2), %s659_s17, 15  ;;  %677 = vset.pattern.permute.xlu1 (!%p175_p2), %v702_v0  ;;  %676 = vset.pattern.permute.xlu0 (!%p175_p2), %v702_v0  ;;  %v468_v34 = vld [vmem:[%s958_s2 + $0x8] sm:$0xf] (!%p175_p2)  ;;  %v466_v35 = vld [vmem:[%s958_s2] sm:$0xf] (!%p175_p2) }
   0x7   : > { %v469_v36 = vld [vmem:[%s958_s2 + $0xc] sm:$0xf] (!%p175_p2)  ;;  %v475_v37 = vld [vmem:[%s959_s3 + $0x4] sm:$0xf] (!%p175_p2)  ;;  %v470_v38 = vld [vmem:[%s958_s2 + $0x10] sm:$0xf] (!%p175_p2) }
   0x8   : > { %v471_v39 = vld [vmem:[%s958_s2 + $0x14] sm:$0xf] (!%p175_p2)  ;;  %v472_v40 = vld [vmem:[%s958_s2 + $0x18] sm:$0xf] (!%p175_p2)  ;;  %v473_v41 = vld [vmem:[%s958_s2 + $0x1c] sm:$0xf] (!%p175_p2) }
   0x9   : > { %v474_v42 = vld [vmem:[%s959_s3] sm:$0xf] (!%p175_p2)  ;;  %v476_v43 = vld [vmem:[%s959_s3 + $0x8] sm:$0xf] (!%p175_p2) }
   0xd   : > { %s962_s17 = smov (!%p206_p3, %s659_s17), 15 }
   0xe   : > { %s736_s18 = sshll.u32 %s962_s17, 2 }
   0xf   : > { %s209_s21 = scalar_lea.vmem %s956_s0, %s736_s18  ;;  %s215_s24 = scalar_lea.vmem %s957_s1, %s736_s18 }
  0x10   : > { %v225_v1 = vld [vmem:[%s209_s21 + $0x8] sm:$0xf]  ;;  %v223_v3 = vld [vmem:[%s209_s21] sm:$0xf]  ;;  %v226_v6 = vld [vmem:[%s209_s21 + $0xc] sm:$0xf]  ;;  %s918_s9 = scalar_lea.vmem %s960_s4, %s736_s18 }
  0x11   : > { %v233_v2 = vld [vmem:[%s215_s24 + $0x8] sm:$0xf]  ;;  %v231_v5 = vld [vmem:[%s215_s24] sm:$0xf]  ;;  %v234_v7 = vld [vmem:[%s215_s24 + $0xc] sm:$0xf] }
  0x12   : > { %v746_v4 = vadd.f32 %v233_v2, %v225_v1  ;;  %v748_v8 = vadd.f32 %v231_v5, %v223_v3  ;;  %v750_v9 = vadd.f32 %v234_v7, %v226_v6  ;;  %v224_v10 = vld [vmem:[%s209_s21 + $0x4] sm:$0xf]  ;;  %v228_v12 = vld [vmem:[%s209_s21 + $0x14] sm:$0xf]  ;;  %v227_v16 = vld [vmem:[%s209_s21 + $0x10] sm:$0xf] }
  0x13   : > { %v232_v11 = vld [vmem:[%s215_s24 + $0x4] sm:$0xf]  ;;  %v236_v15 = vld [vmem:[%s215_s24 + $0x14] sm:$0xf]  ;;  %v235_v18 = vld [vmem:[%s215_s24 + $0x10] sm:$0xf] }
  0x14   : > { %v254_v13 = vsel %vm247_vm0, %v746_v4, 0.0  ;;  %v754_v14 = vadd.f32 %v232_v11, %v224_v10  ;;  %v248_v17 = vsel %vm247_vm0, %v748_v8, 0.0  ;;  %v257_v19 = vsel %vm247_vm0, %v750_v9, 0.0  ;;  %v230_v23 = vld [vmem:[%s209_s21 + $0x1c] sm:$0xf] }
  0x15   : > { %255 = vadd.xlane.f32.xlu1 %v254_v13  ;;  %249 = vadd.xlane.f32.xlu0 %v248_v17  ;;  %v760_v20 = vadd.f32 %v236_v15, %v228_v12  ;;  %v764_v22 = vadd.f32 %v235_v18, %v227_v16  ;;  %v238_v24 = vld [vmem:[%s215_s24 + $0x1c] sm:$0xf]  ;;  %v229_v25 = vld [vmem:[%s209_s21 + $0x18] sm:$0xf] }
  0x16   : > { %v251_v21 = vsel %vm247_vm0, %v754_v14, 0.0  ;;  %v237_v26 = vld [vmem:[%s215_s24 + $0x18] sm:$0xf]  ;;  %v768_v28 = vadd.f32 %v238_v24, %v230_v23 }
  0x17   : > { %v263_v27 = vsel %vm247_vm0, %v760_v20, 0.0  ;;  %v260_v29 = vsel %vm247_vm0, %v764_v22, 0.0  ;;  %v772_v30 = vadd.f32 %v237_v26, %v229_v25 }
  0x18   : > { %v269_v31 = vsel %vm247_vm0, %v768_v28, 0.0 }
  0x19   : > { %258 = vadd.xlane.f32.xlu1 %v257_v19  ;;  %252 = vadd.xlane.f32.xlu0 %v251_v21  ;;  %v266_v32 = vsel %vm247_vm0, %v772_v30, 0.0 }
  0x1d   : > { %264 = vadd.xlane.f32.xlu1 %v263_v27  ;;  %261 = vadd.xlane.f32.xlu0 %v260_v29 }
  0x21   : > { %270 = vadd.xlane.f32.xlu1 %v269_v31  ;;  %267 = vadd.xlane.f32.xlu0 %v266_v32 }
  0x32   : > { %489 = vperm.xlu1 %677, %v467_v33  }
  0x36   : > { %494 = vperm.xlu1 %677, %v468_v34  }
  0x37   : > { %484 = vperm.xlu0 %676, %v466_v35  }
  0x3a   : > { %499 = vperm.xlu1 %677, %v469_v36  }
  0x3b   : > { %537 = vperm.xlu0 %676, %v475_v37  }
  0x3e   : > { %504 = vperm.xlu1 %677, %v470_v38  }
  0x42   : > { %509 = vperm.xlu1 %677, %v471_v39  }
  0x46   : > { %514 = vperm.xlu1 %677, %v472_v40  }
  0x4a   : > { %519 = vperm.xlu1 %677, %v473_v41  }
  0x4e   : > { %532 = vperm.xlu1 %677, %v474_v42  }
  0x52   : > { %542 = vperm.xlu1 %677, %v476_v43  }
  0xa2   : > { %v256_v44 = vpop.xlane.xlu1 %255  ;;  %v250_v46 = vpop.xlane.xlu0 %249 }
  0xa3   : > { %v287_v45 = vsel %vm272_vm1, %v256_v44, 0.0  ;;  %v273_v48 = vsel %vm272_vm1, %v250_v46, 0.0 }
  0xa4   : > { %v288_v47 = vrot.slane %v287_v45, 4  ;;  %v274_v49 = vrot.slane %v273_v48, 4 }
  0xa6   : > { %v289_v50 = vadd.f32 %v288_v47, %v287_v45  ;;  %v259_v51 = vpop.xlane.xlu1 %258  ;;  %v275_v52 = vadd.f32 %v274_v49, %v273_v48  ;;  %v253_v54 = vpop.xlane.xlu0 %252 }
  0xa7   : > { %v294_v53 = vsel %vm272_vm1, %v259_v51, 0.0  ;;  %v280_v57 = vsel %vm272_vm1, %v253_v54, 0.0 }
  0xa8   : > { %v290_v55 = vrot.slane %v289_v50, 2  ;;  %v295_v56 = vrot.slane %v294_v53, 4  ;;  %v276_v58 = vrot.slane %v275_v52, 2  ;;  %v281_v59 = vrot.slane %v280_v57, 4 }
  0xaa   : > { %v291_v60 = vadd.f32 %v290_v55, %v289_v50  ;;  %v296_v61 = vadd.f32 %v295_v56, %v294_v53  ;;  %v265_v62 = vpop.xlane.xlu1 %264  ;;  %v277_v63 = vadd.f32 %v276_v58, %v275_v52  ;;  %v282_v0 = vadd.f32 %v281_v59, %v280_v57  ;;  %v262_v2 = vpop.xlane.xlu0 %261 }
  0xab   : > { %v308_v1 = vsel %vm272_vm1, %v265_v62, 0.0  ;;  %v301_v7 = vsel %vm272_vm1, %v262_v2, 0.0 }
  0xac   : > { %v292_v3 = vrot.slane %v291_v60, 1  ;;  %v297_v5 = vrot.slane %v296_v61, 2  ;;  %v309_v6 = vrot.slane %v308_v1, 4  ;;  %v278_v10 = vrot.slane %v277_v63, 1 }
  0xad   : > { %v283_v11 = vrot.slane %v282_v0, 2  ;;  %v302_v12 = vrot.slane %v301_v7, 4 }
  0xae   : > { %v293_v13 = vadd.f32 %v292_v3, %v291_v60  ;;  %v298_v15 = vadd.f32 %v297_v5, %v296_v61  ;;  %v310_v16 = vadd.f32 %v309_v6, %v308_v1  ;;  %v271_v17 = vpop.xlane.xlu1 %270  ;;  %v279_v18 = vadd.f32 %v278_v10, %v277_v63  ;;  %v268_v24 = vpop.xlane.xlu0 %267 }
  0xaf   : > { %v284_v19 = vadd.f32 %v283_v11, %v282_v0  ;;  %v303_v21 = vadd.f32 %v302_v12, %v301_v7  ;;  %v322_v23 = vsel %vm272_vm1, %v271_v17, 0.0  ;;  %v315_v34 = vsel %vm272_vm1, %v268_v24, 0.0  ;;  %v477_v17 = vld [vmem:[%s959_s3 + $0xc] sm:$0xf] }
  0xb0   : > { %v332_v25 = vmul.f32 0.00390625, %v293_v13  ;;  %v299_v26 = vrot.slane %v298_v15, 1  ;;  %v311_v27 = vrot.slane %v310_v16, 2  ;;  %v323_v29 = vrot.slane %v322_v23, 4 }
  0xb1   : > { %v330_v31 = vmul.f32 0.00390625, %v279_v18  ;;  %v285_v32 = vrot.slane %v284_v19, 1  ;;  %v304_v33 = vrot.slane %v303_v21, 2  ;;  %v316_v38 = vrot.slane %v315_v34, 4  ;;  %v480_v18 = vld [vmem:[%s959_s3 + $0x18] sm:$0xf] }
  0xb2   : > { %v300_v35 = vadd.f32 %v299_v26, %v298_v15  ;;  %v312_v36 = vadd.f32 %v311_v27, %v310_v16  ;;  %v324_v37 = vadd.f32 %v323_v29, %v322_v23  ;;  %v823_v42 = vsub.f32 %v746_v4, %v332_v25  ;;  %v882_v23 = vpop.permute.xlu1 %489 }
  0xb3   : > { %v286_v39 = vadd.f32 %v285_v32, %v284_v19  ;;  %v305_v40 = vadd.f32 %v304_v33, %v303_v21  ;;  %v820_v41 = vsub.f32 %v748_v8, %v330_v31  ;;  %v317_v46 = vadd.f32 %v316_v38, %v315_v34  ;;  %v479_v19 = vld [vmem:[%s959_s3 + $0x14] sm:$0xf]  ;;  %v481_v21 = vld [vmem:[%s959_s3 + $0x1c] sm:$0xf] }
  0xb4   : > { %v333_v43 = vmul.f32 0.00390625, %v300_v35  ;;  %v313_v44 = vrot.slane %v312_v36, 1  ;;  %v325_v45 = vrot.slane %v324_v37, 2  ;;  %v348_v53 = vmul.f32 %v823_v42, %v823_v42 }
  0xb5   : > { %v331_v47 = vmul.f32 0.00390625, %v286_v39  ;;  %v306_v48 = vrot.slane %v305_v40, 1  ;;  %v346_v49 = vmul.f32 %v820_v41, %v820_v41  ;;  %v318_v52 = vrot.slane %v317_v46, 2 }
  0xb6   : > { %v314_v50 = vadd.f32 %v313_v44, %v312_v36  ;;  %v326_v51 = vadd.f32 %v325_v45, %v324_v37  ;;  %v834_v55 = vsub.f32 %v750_v9, %v333_v43  ;;  %v360_v63 = vsel %vm247_vm0, %v348_v53, 0.0  ;;  %v884_v24 = vpop.permute.xlu1 %494  ;;  %v896_v32 = vpop.permute.xlu0 %484 }
  0xb7   : > { %v307_v8 = vadd.f32 %v306_v48, %v305_v40  ;;  %v354_v54 = vsel %vm247_vm0, %v346_v49, 0.0  ;;  %v831_v4 = vsub.f32 %v754_v14, %v331_v47  ;;  %v319_v58 = vadd.f32 %v318_v52, %v317_v46 }
  0xb8   : > { %v335_v56 = vmul.f32 0.00390625, %v314_v50  ;;  %v327_v57 = vrot.slane %v326_v51, 1  ;;  %355 = vadd.xlane.f32.xlu0 %v354_v54  ;;  %v349_v14 = vmul.f32 %v834_v55, %v834_v55 }
  0xb9   : > { %v334_v59 = vmul.f32 0.00390625, %v307_v8  ;;  %v347_v60 = vmul.f32 %v831_v4, %v831_v4  ;;  %v320_v62 = vrot.slane %v319_v58, 1 }
  0xba   : > { %v328_v61 = vadd.f32 %v327_v57, %v326_v51  ;;  %v846_v1 = vsub.f32 %v760_v20, %v335_v56  ;;  %v363_v7 = vsel %vm247_vm0, %v349_v14, 0.0  ;;  %v886_v25 = vpop.permute.xlu1 %499  ;;  %v900_v34 = vpop.permute.xlu0 %537 }
  0xbb   : > { %v357_v0 = vsel %vm247_vm0, %v347_v60, 0.0  ;;  %v843_v9 = vsub.f32 %v764_v22, %v334_v59  ;;  %v321_v3 = vadd.f32 %v320_v62, %v319_v58 }
  0xbc   : > { %v337_v2 = vmul.f32 0.00390625, %v328_v61  ;;  %361 = vadd.xlane.f32.xlu0 %v360_v63  ;;  %358 = vadd.xlane.f32.xlu1 %v357_v0  ;;  %v351_v11 = vmul.f32 %v846_v1, %v846_v1 }
  0xbd   : > { %v350_v5 = vmul.f32 %v843_v9, %v843_v9  ;;  %v336_v6 = vmul.f32 0.00390625, %v321_v3 }
  0xbe   : > { %v855_v22 = vsub.f32 %v768_v28, %v337_v2  ;;  %v369_v13 = vsel %vm247_vm0, %v351_v11, 0.0  ;;  %v888_v26 = vpop.permute.xlu1 %504 }
  0xbf   : > { %v366_v10 = vsel %vm247_vm0, %v350_v5, 0.0  ;;  %v858_v20 = vsub.f32 %v772_v30, %v336_v6  ;;  %v478_v30 = vld [vmem:[%s959_s3 + $0x10] sm:$0xf] }
  0xc0   : > { %364 = vadd.xlane.f32.xlu1 %v363_v7  ;;  %367 = vadd.xlane.f32.xlu0 %v366_v10  ;;  %v353_v15 = vmul.f32 %v855_v22, %v855_v22 }
  0xc1   : > { %v352_v12 = vmul.f32 %v858_v20, %v858_v20 }
  0xc2   : > { %v375_v28 = vsel %vm247_vm0, %v353_v15, 0.0  ;;  %v890_v27 = vpop.permute.xlu1 %509 }
  0xc3   : > { %v372_v16 = vsel %vm247_vm0, %v352_v12, 0.0 }
  0xc4   : > { %370 = vadd.xlane.f32.xlu1 %v369_v13  ;;  %373 = vadd.xlane.f32.xlu0 %v372_v16 }
  0xc6   : > { %v892_v29 = vpop.permute.xlu1 %514 }
  0xc8   : > { %376 = vadd.xlane.f32.xlu1 %v375_v28 }
  0xca   : > { %v894_v31 = vpop.permute.xlu1 %519 }
  0xce   : > { %v898_v33 = vpop.permute.xlu1 %532 }
  0xd2   : > { %v902_v35 = vpop.permute.xlu1 %542 }
  0xd9   : > { %552 = vperm.xlu1 %677, %v478_v30  }
  0xda   : > { %547 = vperm.xlu0 %676, %v477_v17  }
  0xdd   : > { %562 = vperm.xlu1 %677, %v480_v18  }
  0xde   : > { %557 = vperm.xlu0 %676, %v479_v19  }
  0xe2   : > { %567 = vperm.xlu0 %676, %v481_v21  }
 0x145   : > { %v356_v36 = vpop.xlane.xlu0 %355 }
 0x146   : > { %v378_v37 = vsel %vm272_vm1, %v356_v36, 0.0 }
 0x147   : > { %v379_v38 = vrot.slane %v378_v37, 4 }
 0x149   : > { %v380_v39 = vadd.f32 %v379_v38, %v378_v37  ;;  %v359_v40 = vpop.xlane.xlu1 %358  ;;  %v362_v43 = vpop.xlane.xlu0 %361 }
 0x14a   : > { %v385_v44 = vsel %vm272_vm1, %v359_v40, 0.0  ;;  %v392_v45 = vsel %vm272_vm1, %v362_v43, 0.0 }
 0x14b   : > { %v381_v46 = vrot.slane %v380_v39, 2  ;;  %v386_v47 = vrot.slane %v385_v44, 4  ;;  %v393_v48 = vrot.slane %v392_v45, 4 }
 0x14d   : > { %v382_v49 = vadd.f32 %v381_v46, %v380_v39  ;;  %v387_v50 = vadd.f32 %v386_v47, %v385_v44  ;;  %v394_v51 = vadd.f32 %v393_v48, %v392_v45  ;;  %v365_v52 = vpop.xlane.xlu1 %364  ;;  %v368_v53 = vpop.xlane.xlu0 %367 }
 0x14e   : > { %v399_v8 = vsel %vm272_vm1, %v365_v52, 0.0  ;;  %v406_v54 = vsel %vm272_vm1, %v368_v53, 0.0 }
 0x14f   : > { %v383_v56 = vrot.slane %v382_v49, 1  ;;  %v388_v57 = vrot.slane %v387_v50, 2  ;;  %v395_v58 = vrot.slane %v394_v51, 2  ;;  %v400_v59 = vrot.slane %v399_v8, 4 }
 0x150   : > { %v407_v60 = vrot.slane %v406_v54, 4 }
 0x151   : > { %v384_v61 = vadd.f32 %v383_v56, %v382_v49  ;;  %v389_v62 = vadd.f32 %v388_v57, %v387_v50  ;;  %v396_v63 = vadd.f32 %v395_v58, %v394_v51  ;;  %v401_v0 = vadd.f32 %v400_v59, %v399_v8  ;;  %v371_v14 = vpop.xlane.xlu1 %370  ;;  %v374_v5 = vpop.xlane.xlu0 %373 }
 0x152   : > { %v408_v2 = vadd.f32 %v407_v60, %v406_v54  ;;  %v413_v3 = vsel %vm272_vm1, %v371_v14, 0.0  ;;  %v420_v15 = vsel %vm272_vm1, %v374_v5, 0.0 }
 0x153   : > { %v434_v6 = vmul.f32 0.00390625, %v384_v61  ;;  %v390_v7 = vrot.slane %v389_v62, 1  ;;  %v397_v10 = vrot.slane %v396_v63, 1  ;;  %v402_v11 = vrot.slane %v401_v0, 2 }
 0x154   : > { %v409_v12 = vrot.slane %v408_v2, 2  ;;  %v414_v13 = vrot.slane %v413_v3, 4  ;;  %v421_v36 = vrot.slane %v420_v15, 4 }
 0x155   : > { %v442_v16 = vadd.f32 1e-05, %v434_v6  ;;  %v391_v28 = vadd.f32 %v390_v7, %v389_v62  ;;  %v398_v30 = vadd.f32 %v397_v10, %v396_v63  ;;  %v403_v17 = vadd.f32 %v402_v11, %v401_v0  ;;  %v377_v18 = vpop.xlane.xlu1 %376 }
 0x156   : > { %v410_v19 = vadd.f32 %v409_v12, %v408_v2  ;;  %v415_v21 = vadd.f32 %v414_v13, %v413_v3  ;;  %v427_v37 = vsel %vm272_vm1, %v377_v18, 0.0  ;;  %v422_v45 = vadd.f32 %v421_v36, %v420_v15 }
 0x157   : > { %678 = vrsqrt.f32 %v442_v16  ;;  %v435_v38 = vmul.f32 0.00390625, %v391_v28  ;;  %v436_v39 = vmul.f32 0.00390625, %v398_v30  ;;  %v404_v40 = vrot.slane %v403_v17, 1 }
 0x158   : > { %v411_v43 = vrot.slane %v410_v19, 1  ;;  %v416_v44 = vrot.slane %v415_v21, 2  ;;  %v428_v46 = vrot.slane %v427_v37, 4  ;;  %v423_v52 = vrot.slane %v422_v45, 2 }
 0x159   : > { %v443_v47 = vadd.f32 1e-05, %v435_v38  ;;  %v444_v48 = vadd.f32 1e-05, %v436_v39  ;;  %v405_v49 = vadd.f32 %v404_v40, %v403_v17  ;;  %v553_v39 = vpop.permute.xlu1 %552 }
 0x15a   : > { %v412_v50 = vadd.f32 %v411_v43, %v410_v19  ;;  %v417_v51 = vadd.f32 %v416_v44, %v415_v21  ;;  %v429_v53 = vadd.f32 %v428_v46, %v427_v37  ;;  %v424_v57 = vadd.f32 %v423_v52, %v422_v45  ;;  %v548_v37 = vpop.permute.xlu0 %547 }
 0x15b   : > { %680 = vrsqrt.f32 %v443_v47  ;;  %v437_v8 = vmul.f32 0.00390625, %v405_v49 }
 0x15c   : > { %682 = vrsqrt.f32 %v444_v48  ;;  %v438_v54 = vmul.f32 0.00390625, %v412_v50  ;;  %v418_v56 = vrot.slane %v417_v51, 1  ;;  %v430_v59 = vrot.slane %v429_v53, 2 }
 0x15d   : > { %v445_v58 = vadd.f32 1e-05, %v437_v8  ;;  %v425_v62 = vrot.slane %v424_v57, 1  ;;  %v563_v46 = vpop.permute.xlu1 %562 }
 0x15e   : > { %v446_v60 = vadd.f32 1e-05, %v438_v54  ;;  %v419_v61 = vadd.f32 %v418_v56, %v417_v51  ;;  %v431_v63 = vadd.f32 %v430_v59, %v429_v53 }
 0x15f   : > { %684 = vrsqrt.f32 %v445_v58  ;;  %v426_v14 = vadd.f32 %v425_v62, %v424_v57 }
 0x160   : > { %686 = vrsqrt.f32 %v446_v60  ;;  %v439_v0 = vmul.f32 0.00390625, %v419_v61  ;;  %v432_v3 = vrot.slane %v431_v63, 1 }
 0x161   : > { %v679_v2 = vpop.eup %678  ;;  %v440_v7 = vmul.f32 0.00390625, %v426_v14 }
 0x162   : > { %v458_v5 = vmul.f32 %v679_v2, %v820_v41  ;;  %v447_v6 = vadd.f32 1e-05, %v439_v0  ;;  %v433_v10 = vadd.f32 %v432_v3, %v431_v63 }
 0x163   : > { %v448_v12 = vadd.f32 1e-05, %v440_v7 }
 0x164   : > { %v522_v11 = vmul.f32 %v896_v32, %v458_v5  ;;  %688 = vrsqrt.f32 %v447_v6  ;;  %v441_v15 = vmul.f32 0.00390625, %v433_v10 }
 0x165   : > { %v681_v13 = vpop.eup %680  ;;  %690 = vrsqrt.f32 %v448_v12 }
 0x166   : > { %v683_v16 = vpop.eup %682  ;;  %v570_v28 = vadd.f32 %v898_v33, %v522_v11  ;;  %v459_v41 = vmul.f32 %v681_v13, %v831_v4  ;;  %v449_v32 = vadd.f32 1e-05, %v441_v15 }
 0x167   : > { %v460_v30 = vmul.f32 %v683_v16, %v823_v42 }
 0x168   : > { %v523_v17 = vmul.f32 %v882_v23, %v459_v41  ;;  %578 = vst.msk [vmem:[%s918_s9] sm:$0xf] %vm247_vm0, %v570_v28  ;;  %692 = vrsqrt.f32 %v449_v32 }
 0x169   : > { %v685_v18 = vpop.eup %684  ;;  %v524_v19 = vmul.f32 %v884_v24, %v460_v30 }
 0x16a   : > { %v687_v21 = vpop.eup %686  ;;  %v571_v33 = vadd.f32 %v900_v34, %v523_v17  ;;  %v461_v4 = vmul.f32 %v685_v18, %v834_v55 }
 0x16b   : > { %v572_v36 = vadd.f32 %v902_v35, %v524_v19  ;;  %v462_v42 = vmul.f32 %v687_v21, %v843_v9 }
 0x16c   : > { %579 = vst.msk [vmem:[%s918_s9 + $0x4] sm:$0xf] %vm247_vm0, %v571_v33  ;;  %v525_v23 = vmul.f32 %v886_v25, %v461_v4 }
 0x16d   : > { %v526_v38 = vmul.f32 %v888_v26, %v462_v42  ;;  %580 = vst.msk [vmem:[%s918_s9 + $0x8] sm:$0xf] %vm247_vm0, %v572_v36  ;;  %v558_v26 = vpop.permute.xlu0 %557 }
 0x16e   : > { %v689_v24 = vpop.eup %688  ;;  %v573_v34 = vadd.f32 %v548_v37, %v525_v23 }
 0x16f   : > { %v574_v40 = vadd.f32 %v553_v39, %v526_v38  ;;  %v463_v55 = vmul.f32 %v689_v24, %v846_v1  ;;  %v691_v35 = vpop.eup %690 }
 0x170   : > { %581 = vst.msk [vmem:[%s918_s9 + $0xc] sm:$0xf] %vm247_vm0, %v573_v34  ;;  %v464_v9 = vmul.f32 %v691_v35, %v858_v20 }
 0x171   : > { %582 = vst.msk [vmem:[%s918_s9 + $0x10] sm:$0xf] %vm247_vm0, %v574_v40  ;;  %v527_v25 = vmul.f32 %v890_v27, %v463_v55  ;;  %v568_v49 = vpop.permute.xlu0 %567 }
 0x172   : > { %v693_v43 = vpop.eup %692  ;;  %v528_v44 = vmul.f32 %v892_v29, %v464_v9 }
 0x173   : > { %v575_v45 = vadd.f32 %v558_v26, %v527_v25  ;;  %v465_v47 = vmul.f32 %v693_v43, %v855_v22 }
 0x174   : > { %v576_v48 = vadd.f32 %v563_v46, %v528_v44 }
 0x175   : > { %583 = vst.msk [vmem:[%s918_s9 + $0x14] sm:$0xf] %vm247_vm0, %v575_v45  ;;  %v529_v1 = vmul.f32 %v894_v31, %v465_v47 }
 0x176   : > { %584 = vst.msk [vmem:[%s918_s9 + $0x18] sm:$0xf] %vm247_vm0, %v576_v48 }
 0x177   : > { %v577_v50 = vadd.f32 %v568_v49, %v529_v1 }
 0x179   : > { %585 = vst.msk [vmem:[%s918_s9 + $0x1c] sm:$0xf] %vm247_vm0, %v577_v50 }
 0x17a PF: > { %s14_s15 = sadd.s32 1, %s700_s15  }
 0x17b   : > { %p11_p4 = scmp.ge.s32.totalorder %s14_s15, 4  }
 0x17d   :  { %13 = sbr.rel (!%p11_p4) target bundleno = 1 (0x1), region = 69 }

// kernel: self_attention_forward.11
= control target key start
LH: loop header
LB: loop body
LE: loop exit
PB: predicated region body
PF: predicated region fallthrough
CT: control target
= control target key end

     0   :  { %10 = vsyncpa [#allocation3], 0  ;;  %s1045_s0 = inlined_call_operand.vmem [shape: f32[128,32], index: 0, kind: input, shape index: {}]   ;;  %s1046_s1 = inlined_call_operand.vmem [shape: f32[32,128], index: 1, kind: input, shape index: {}]   ;;  %s1047_s2 = inlined_call_operand.vmem [shape: f32[1,128], index: 2, kind: input, shape index: {}]   ;;  %s1048_s3 = inlined_call_operand.vmem [shape: f32[128,32], index: 3, kind: input, shape index: {}]   ;;  %s1049_s4 = inlined_call_operand.vmem [shape: f32[1,32], index: 4, kind: input, shape index: {}]   ;;  %s1050_s5 = inlined_call_operand.hbm [shape: f32[128,32], index: 5, kind: output, shape index: {}]  }
   0x1   :  { %12 = vsyncpa [#allocation3 + $0x1], 0  ;;  %s829_s18 = smov 0   ;;  %s831_s19 = smov 0  }
   0x2   :  { %s833_s20 = smov 0   ;;  %s835_s21 = smov 0  }
   0x3 LB: > { %s850_s22 = sadd.s32 4294967295, %s794_s21   ;;  %s578_s23 = sadd.s32 4294967294, %s794_s21   ;;  %s794_s21 = sphi %s835_s21, %s1056_s21   ;;  %s790_s20 = sphi %s833_s20, %s1055_s20   ;;  %s786_s19 = sphi %s831_s19, %s1054_s19   ;;  %s782_s18 = sphi %s829_s18, %s1053_s18  }
   0x4   : > { %s854_s24 = sadd.s32 1, %s794_s21   ;;  %s135_s25 = sadd.s32 1, %s790_s20 }
   0x5   : > { %s132_s26 = ssub.s32 %s794_s21, %s854_s24  ;;  %p145_p0 = scmp.ne.s32.totalorder %s790_s20, %s786_s19 }
   0x6   : > { %p133_p1 = scmp.eq.s32.totalorder %s132_s26, 0  ;;  %p146_p2 = scmp.eq.s32.totalorder %s850_s22, 1 }
   0x7   : > { %p151_p3 = scmp.ne.s32.totalorder %s786_s19, %s782_s18  ;;  %p152_p4 = scmp.eq.s32.totalorder %s578_s23, 1 }
   0x8   : > { %s865_s27 = scalar_select %p133_p1, %s790_s20, %s135_s25  }
   0x9   : > { %p867_p5 = por %p146_p2, %p145_p0  ;;  %p871_p6 = por %p152_p4, %p151_p3 }
   0xa   : > { %p581_p7 = scmp.ge.s32.totalorder %s794_s21, 1  ;;  %p191_p8 = scmp.lt.s32.totalorder %s794_s21, 3 }
   0xc   : > { %p192_p9 = pnand %p581_p7, %p191_p8 }
   0xd   : > { %v239_v0 = vld [vmem:[%s1046_s1] sm:$0xff] (!%p192_p9)  ;;  %v240_v1 = vld [vmem:[%s1046_s1 + $0x8] sm:$0xff] (!%p192_p9)  ;;  %v241_v2 = vld [vmem:[%s1046_s1 + $0x10] sm:$0xff] (!%p192_p9)  ;;  %s583_s11 = sshll.u32 (!%p192_p9), %s850_s22, 3  ;;  %vm252_vm0 = vcmask (!%p192_p9), 261120   ;;  %s216_s26 = sand.u32 (!%p192_p9), 1, %s786_s19  }
   0xe   : > { %195 = sbr.rel (%p192_p9) target bundleno = 518 (0x206), region = 40  ;;  %v243_v3 = vpack.c.bf16 (!%p192_p9), %v240_v1, %v239_v0  ;;  %v242_v4 = vld [vmem:[%s1046_s1 + $0x18] sm:$0xff] (!%p192_p9)  ;;  %p220_p10 = scmp.lt.s32.totalorder (!%p192_p9), %s583_s11, 15  ;;  %v390_v18 = vld [vmem:[%s1048_s3] sm:$0xff] (!%p192_p9)  ;;  %v391_v19 = vld [vmem:[%s1048_s3 + $0x8] sm:$0xff] (!%p192_p9) }
   0xf   : > { %v244_v5 = vpack.c.bf16 (!%p192_p9), %v242_v4, %v241_v2  ;;  %v406_v20 = vpack.c.bf16 (!%p192_p9), %v391_v19, %v390_v18  ;;  %v392_v21 = vld [vmem:[%s1048_s3 + $0x10] sm:$0xff] (!%p192_p9)  ;;  %v393_v22 = vld [vmem:[%s1048_s3 + $0x18] sm:$0xff] (!%p192_p9)  ;;  %v394_v24 = vld [vmem:[%s1048_s3 + $0x20] sm:$0xff] (!%p192_p9)  ;;  %s582_s7 = sshll.u32 (!%p192_p9), %s216_s26, 6  ;;  %s604_s9 = sshll.u32 (!%p192_p9), %s850_s22, 10 }
  0x10   : > { %623 = vmatprep.subr.bf16.mxu0 (!%p192_p9), %v243_v3  ;;  %v407_v23 = vpack.c.bf16 (!%p192_p9), %v393_v22, %v392_v21  ;;  %v395_v25 = vld [vmem:[%s1048_s3 + $0x28] sm:$0xff] (!%p192_p9)  ;;  %v396_v27 = vld [vmem:[%s1048_s3 + $0x30] sm:$0xff] (!%p192_p9)  ;;  %v397_v28 = vld [vmem:[%s1048_s3 + $0x38] sm:$0xff] (!%p192_p9)  ;;  %s218_s8 = scalar_lea.vmem (!%p192_p9), [#allocation2], %s582_s7  ;;  %s994_s13 = scalar_lea.hbm (!%p192_p9), %s1050_s5, %s604_s9 }
  0x11   : > { %624 = vmatpush3.bf16.msra.mxu0 (!%p192_p9), %v243_v3  ;;  %635 = vmatprep.subr.bf16.mxu1 (!%p192_p9), %v406_v20  ;;  %v408_v26 = vpack.c.bf16 (!%p192_p9), %v395_v25, %v394_v24  ;;  %v409_v29 = vpack.c.bf16 (!%p192_p9), %v397_v28, %v396_v27  ;;  %v398_v30 = vld [vmem:[%s1048_s3 + $0x40] sm:$0xff] (!%p192_p9)  ;;  %v399_v31 = vld [vmem:[%s1048_s3 + $0x48] sm:$0xff] (!%p192_p9)  ;;  %v400_v33 = vld [vmem:[%s1048_s3 + $0x50] sm:$0xff] (!%p192_p9)  ;;  %s516_s10 = sshll.u32 (!%p192_p9), %s218_s8, 4  ;;  %s1004_s22 = scalar_lea.sflag (!%p192_p9), [#allocation3], %s216_s26  ;;  %s996_s10 = int_to_ptr.vmem [resolvable:$true] %s516_s10 }
  0x12   : > { %625 = vmatprep.subr.bf16.mxu0 (!%p192_p9), %v244_v5  ;;  %636 = vmatpush3.bf16.msra.mxu1 (!%p192_p9), %v406_v20  ;;  %v410_v32 = vpack.c.bf16 (!%p192_p9), %v399_v31, %v398_v30  ;;  %v401_v34 = vld [vmem:[%s1048_s3 + $0x58] sm:$0xff] (!%p192_p9)  ;;  %v402_v36 = vld [vmem:[%s1048_s3 + $0x60] sm:$0xff] (!%p192_p9)  ;;  %v403_v37 = vld [vmem:[%s1048_s3 + $0x68] sm:$0xff] (!%p192_p9)  ;;  %s796_s15 = smov (!%p192_p9), [#allocation2]  }
  0x13   : > { %637 = vmatprep.subr.bf16.mxu1 (!%p192_p9), %v407_v23  ;;  %v411_v35 = vpack.c.bf16 (!%p192_p9), %v401_v34, %v400_v33  ;;  %v412_v38 = vpack.c.bf16 (!%p192_p9), %v403_v37, %v402_v36  ;;  %v404_v39 = vld [vmem:[%s1048_s3 + $0x70] sm:$0xff] (!%p192_p9)  ;;  %v405_v40 = vld [vmem:[%s1048_s3 + $0x78] sm:$0xff] (!%p192_p9)  ;;  %v585_v42 = vld [vmem:[%s1047_s2] ss:$0 sm:$0xff] (!%p192_p9)  ;;  %s736_s16 = sshll.u32 (!%p192_p9), %s796_s15, 4  ;;  %s737_s16 = int_to_ptr.vmem [resolvable:$false] %s736_s16 }
  0x14   : > { %v413_v41 = vpack.c.bf16 (!%p192_p9), %v405_v40, %v404_v39  ;;  %p739_p0 = scmp.lt.s32.totalorder (!%p192_p9), %s996_s10, %s737_s16 }
  0x15   : > { %s1058_s11 = smov (!%p220_p10, %s583_s11), 15  ;;  %626 = vmatpush3.bf16.msra.mxu0 %v244_v5 }
  0x16   : > { %s584_s14 = sshll.u32 %s1058_s11, 3  ;;  %638 = vmatpush3.bf16.msra.mxu1 %v407_v23 }
  0x17   : > { %s223_s17 = scalar_lea.vmem %s1045_s0, %s584_s14  ;;  %639 = vmatprep.subr.bf16.mxu1 %v408_v26  ;;  %s732_s14 = scalar_lea.vmem %s996_s10, 1024 }
  0x18   : > { %v893_v6 = vld [vmem:[%s223_s17] sm:$0xff]  ;;  %v895_v7 = vld [vmem:[%s223_s17 + $0x8] sm:$0xff]  ;;  %v897_v8 = vld [vmem:[%s223_s17 + $0x10] sm:$0xff]  ;;  %p733_p11 = scmp.ne.s32.totalorder %s996_s10, %s732_s14 }
  0x19   : > { %v235_v9 = vpack.c.bf16 %v895_v7, %v893_v6  ;;  %v901_v10 = vld [vmem:[%s223_s17 + $0x18] sm:$0xff]  ;;  %v903_v11 = vld [vmem:[%s223_s17 + $0x20] sm:$0xff]  ;;  %v905_v12 = vld [vmem:[%s223_s17 + $0x28] sm:$0xff] }
  0x1a   : > { %v236_v13 = vpack.c.bf16 %v901_v10, %v897_v8  ;;  %v237_v14 = vpack.c.bf16 %v905_v12, %v903_v11  ;;  %v914_v15 = vld [vmem:[%s223_s17 + $0x30] sm:$0xff]  ;;  %v916_v16 = vld [vmem:[%s223_s17 + $0x38] sm:$0xff]  ;;  %640 = vmatpush3.bf16.msra.mxu1 %v408_v26  ;;  %p734_p12 = pnand %p733_p11, %p867_p5  ;;  %s738_s17 = scalar_lea.vmem %s737_s16, 2048 }
  0x1b   : > { %627 = vmatprep.mubr.msk.bf16.mxu0 %vm252_vm0, %v235_v9  ;;  %v238_v17 = vpack.c.bf16 %v916_v16, %v914_v15  ;;  %641 = vmatprep.subr.bf16.mxu1 %v409_v29  ;;  %p740_p1 = scmp.lt.s32.totalorder %s738_s17, %s732_s14 }
  0x1c   : > { %628 = vmatmul.mubr.msk.bf16.vlgmr.msra.gmra.mrb[0].mxu0 %vm252_vm0, %v236_v13  ;;  %p735_p13 = pneg %p734_p12 }
  0x1d   : > { %631 = vmatprep.mubr.msk.bf16.mxu0 %vm252_vm0, %v237_v14  ;;  %p741_p2 = por %p740_p1, %p739_p0 }
  0x1e   : > { %642 = vmatpush3.bf16.msra.mxu1 %v409_v29 }
  0x1f   : > { %643 = vmatprep.subr.bf16.mxu1 %v410_v32  ;;  %p742_p3 = pnand %p741_p2, %p735_p13 }
  0x22   : > { %644 = vmatpush3.bf16.msra.mxu1 %v410_v32 }
  0x23   : > { %645 = vmatprep.subr.bf16.mxu1 %v411_v35 }
  0x24   : > { %632 = vmatmul.mubr.msk.bf16.gmra.mrb[4].mxu0 %vm252_vm0, %v238_v17 }
  0x26   : > { %646 = vmatpush3.bf16.msra.mxu1 %v411_v35 }
  0x27   : > { %647 = vmatprep.subr.bf16.mxu1 %v412_v38 }
  0x2a   : > { %648 = vmatpush3.bf16.msra.mxu1 %v412_v38 }
  0x2b   : > { %649 = vmatprep.subr.bf16.mxu1 %v413_v41 }
  0x2e   : > { %650 = vmatpush3.bf16.msra.mxu1 %v413_v41 }
  0xef   : > { %v629_v43 = vpop.f32.mrb[0].mxu0 }
  0xf0   : > { %v308_v44 = vadd.f32 %v629_v43, %v585_v42  ;;  %v299_v45 = vpop.f32.mrb[1].mxu0 }
  0xf1   : > { %v300_v46 = vadd.f32 %v585_v42, %v299_v45  ;;  %v630_v47 = vpop.f32.mrb[2].mxu0 }
  0xf2   : > { %v592_v48 = vmul.f32 -1.442695, %v308_v44  ;;  %v311_v49 = vadd.f32 %v630_v47, %v585_v42  ;;  %v302_v50 = vpop.f32.mrb[3].mxu0 }
  0xf3   : > { %v590_v51 = vmul.f32 -1.442695, %v300_v46  ;;  %v303_v52 = vadd.f32 %v585_v42, %v302_v50 }
  0xf4   : > { %700 = vpow2.f32 %v592_v48  ;;  %v593_v53 = vmul.f32 -1.442695, %v311_v49 }
  0xf5   : > { %702 = vpow2.f32 %v590_v51  ;;  %v591_v54 = vmul.f32 -1.442695, %v303_v52 }
  0xf6   : > { %704 = vpow2.f32 %v593_v53 }
  0xf7   : > { %706 = vpow2.f32 %v591_v54  ;;  %v633_v55 = vpop.f32.mrb[4].mxu0 }
  0xf8   : > { %v324_v56 = vadd.f32 %v633_v55, %v585_v42  ;;  %v315_v57 = vpop.f32.mrb[5].mxu0 }
  0xf9   : > { %v316_v58 = vadd.f32 %v585_v42, %v315_v57  ;;  %v634_v59 = vpop.f32.mrb[6].mxu0 }
  0xfa   : > { %v596_v60 = vmul.f32 -1.442695, %v324_v56  ;;  %v327_v61 = vadd.f32 %v634_v59, %v585_v42  ;;  %v318_v62 = vpop.f32.mrb[7].mxu0 }
  0xfb   : > { %v594_v63 = vmul.f32 -1.442695, %v316_v58  ;;  %v319_v0 = vadd.f32 %v585_v42, %v318_v62 }
  0xfc   : > { %708 = vpow2.f32 %v596_v60  ;;  %v597_v1 = vmul.f32 -1.442695, %v327_v61 }
  0xfd   : > { %710 = vpow2.f32 %v594_v63  ;;  %v595_v2 = vmul.f32 -1.442695, %v319_v0 }
  0xfe   : > { %v701_v3 = vpop.eup %700  ;;  %712 = vpow2.f32 %v597_v1 }
  0xff   : > { %v703_v4 = vpop.eup %702  ;;  %v356_v5 = vadd.f32 1.0, %v701_v3  ;;  %714 = vpow2.f32 %v595_v2 }
 0x100   : > { %v705_v9 = vpop.eup %704  ;;  %v354_v13 = vadd.f32 1.0, %v703_v4 }
 0x101   : > { %v707_v14 = vpop.eup %706  ;;  %716 = vrcp.f32 %v356_v5  ;;  %v357_v17 = vadd.f32 1.0, %v705_v9 }
 0x102   : > { %718 = vrcp.f32 %v354_v13  ;;  %v355_v18 = vadd.f32 1.0, %v707_v14 }
 0x103   : > { %720 = vrcp.f32 %v357_v17 }
 0x104   : > { %722 = vrcp.f32 %v355_v18 }
 0x106   : > { %v709_v19 = vpop.eup %708 }
 0x107   : > { %v711_v20 = vpop.eup %710  ;;  %v360_v21 = vadd.f32 1.0, %v709_v19 }
 0x108   : > { %v713_v22 = vpop.eup %712  ;;  %v358_v23 = vadd.f32 1.0, %v711_v20 }
 0x109   : > { %v715_v24 = vpop.eup %714  ;;  %724 = vrcp.f32 %v360_v21  ;;  %v361_v25 = vadd.f32 1.0, %v713_v22 }
 0x10a   : > { %726 = vrcp.f32 %v358_v23  ;;  %v359_v26 = vadd.f32 1.0, %v715_v24 }
 0x10b   : > { %v717_v27 = vpop.eup %716  ;;  %728 = vrcp.f32 %v361_v25 }
 0x10c   : > { %v719_v28 = vpop.eup %718  ;;  %730 = vrcp.f32 %v359_v26  ;;  %v380_v31 = vmul.f32 %v717_v27, %v308_v44  ;;  %v598_v44 = vld [vmem:[%s1049_s4] ss:$0 sm:$0xff] }
 0x10d   : > { %v721_v29 = vpop.eup %720  ;;  %v378_v33 = vmul.f32 %v719_v28, %v300_v46 }
 0x10e   : > { %v723_v30 = vpop.eup %722  ;;  %v381_v32 = vmul.f32 %v721_v29, %v311_v49 }
 0x10f   : > { %v379_v34 = vmul.f32 %v723_v30, %v303_v52 }
 0x110   : > { %v387_v35 = vpack.c.bf16 %v381_v32, %v380_v31 }
 0x111   : > { %v386_v36 = vpack.c.bf16 %v379_v34, %v378_v33 }
 0x113   : > { %v725_v37 = vpop.eup %724  ;;  %651 = vmatprep.mubr.bf16.mxu1 %v386_v36 }
 0x114   : > { %v727_v38 = vpop.eup %726  ;;  %652 = vmatmul.mubr.bf16.vlgmr.msra.gmra.mrb[0].mxu1 %v387_v35  ;;  %v384_v41 = vmul.f32 %v725_v37, %v324_v56 }
 0x115   : > { %v729_v39 = vpop.eup %728  ;;  %v382_v43 = vmul.f32 %v727_v38, %v316_v58 }
 0x116   : > { %v731_v40 = vpop.eup %730  ;;  %v385_v42 = vmul.f32 %v729_v39, %v327_v61 }
 0x117   : > { %v383_v45 = vmul.f32 %v731_v40, %v319_v0 }
 0x118   : > { %v389_v47 = vpack.c.bf16 %v385_v42, %v384_v41 }
 0x119   : > { %v388_v48 = vpack.c.bf16 %v383_v45, %v382_v43 }
 0x11b   : > { %655 = vmatprep.mubr.bf16.mxu1 %v388_v48 }
 0x11c   : > { %656 = vmatmul.mubr.bf16.gmra.mrb[4].mxu1 %v389_v47 }
 0x1e7   : > { %v653_v46 = vpop.f32.mrb[0].mxu1 }
 0x1e8   : > { %v464_v49 = vadd.f32 %v653_v46, %v598_v44  ;;  %v455_v50 = vpop.f32.mrb[1].mxu1 }
 0x1e9   : > { %v456_v51 = vadd.f32 %v598_v44, %v455_v50  ;;  %v654_v52 = vpop.f32.mrb[2].mxu1 }
 0x1ea   : > { %v488_v53 = vadd.f32 %v464_v49, %v897_v8  ;;  %v467_v54 = vadd.f32 %v654_v52, %v598_v44  ;;  %v458_v55 = vpop.f32.mrb[3].mxu1 }
 0x1eb   : > { %v486_v56 = vadd.f32 %v456_v51, %v893_v6  ;;  %v459_v57 = vadd.f32 %v598_v44, %v458_v55 }
 0x1ec   : > { %496 = vst.msk [vmem:[%s218_s8 + $0x10] sm:$0xff] %vm252_vm0, %v488_v53  ;;  %v489_v58 = vadd.f32 %v467_v54, %v901_v10 }
 0x1ed   : > { %494 = vst.msk [vmem:[%s218_s8] sm:$0xff] %vm252_vm0, %v486_v56  ;;  %v487_v59 = vadd.f32 %v459_v57, %v895_v7 }
 0x1ee   : > { %497 = vst.msk [vmem:[%s218_s8 + $0x18] sm:$0xff] %vm252_vm0, %v489_v58 }
 0x1ef   : > { %495 = vst.msk [vmem:[%s218_s8 + $0x8] sm:$0xff] %vm252_vm0, %v487_v59  ;;  %v657_v8 = vpop.f32.mrb[4].mxu1 }
 0x1f0   : > { %v480_v60 = vadd.f32 %v657_v8, %v598_v44  ;;  %v471_v61 = vpop.f32.mrb[5].mxu1 }
 0x1f1   : > { %v472_v62 = vadd.f32 %v598_v44, %v471_v61  ;;  %v658_v63 = vpop.f32.mrb[6].mxu1 }
 0x1f2   : > { %v492_v6 = vadd.f32 %v480_v60, %v914_v15  ;;  %v483_v10 = vadd.f32 %v658_v63, %v598_v44  ;;  %v474_v0 = vpop.f32.mrb[7].mxu1 }
 0x1f3   : > { %v490_v1 = vadd.f32 %v472_v62, %v903_v11  ;;  %v475_v7 = vadd.f32 %v598_v44, %v474_v0 }
 0x1f4   : > { %500 = vst.msk [vmem:[%s218_s8 + $0x30] sm:$0xff] %vm252_vm0, %v492_v6  ;;  %v493_v2 = vadd.f32 %v483_v10, %v916_v16 }
 0x1f5   : > { %498 = vst.msk [vmem:[%s218_s8 + $0x20] sm:$0xff] %vm252_vm0, %v490_v1  ;;  %v491_v15 = vadd.f32 %v475_v7, %v905_v12 }
 0x1f6   : > { %501 = vst.msk [vmem:[%s218_s8 + $0x38] sm:$0xff] %vm252_vm0, %v493_v2 }
 0x1f7   : > { %499 = vst.msk [vmem:[%s218_s8 + $0x28] sm:$0xff] %vm252_vm0, %v491_v15 }
 0x1f8   : > { %745 = shalt.err (!%p742_p3)
}
 0x1f9   : > { %s746_s23 = scalar_lea.hbm %s994_s13, 1024  ;;  %s750_s30 = scalar_lea.hbm %s1050_s5, 2048 }
 0x1fa   : > { %p747_p4 = scmp.ne.s32.totalorder %s994_s13, %s746_s23  ;;  %p751_p9 = scmp.lt.u32.totalorder %s994_s13, %s1050_s5 }
 0x1fb   : > { %p752_p10 = scmp.lt.u32.totalorder %s750_s30, %s746_s23  ;;  %p754_p12 = scmp.lt.u32.totalorder %s746_s23, %s994_s13 }
 0x1fc   : > { %p748_p7 = pnand %p747_p4, %p867_p5 }
 0x1fd   : > { %p753_p11 = por %p752_p10, %p751_p9 }
 0x1fe   : > { %p749_p8 = pneg %p748_p7 }
 0x1ff   : > { %p755_p13 = por %p754_p12, %p753_p11 }
 0x201   : > { %p756_p0 = pnand %p755_p13, %p749_p8 }
 0x203   : > { %759 = shalt.err (!%p756_p0)
}
 0x204   : > { %s797_s8 = smov 128   ;;  %s798_s9 = smov 8  }
 0x205   : > { %659 = dma.vmem_to_hbm [thread:$0]  (%p867_p5), %s996_s10, 1024, %s994_s13, %s1004_s22, %s797_s8, %s797_s8, %s798_s9  }
 0x206 PF: > { %p665_p1 = scmp.ge.s32.totalorder %s794_s21, 2  ;;  %s531_s11 = sand.u32 1, %s782_s18  }
 0x207   : > { %s532_s12 = scalar_lea.sflag [#allocation3], %s531_s11 }
 0x208   : > { %p662_p2 = pnand %p665_p1, %p871_p6 }
 0x20a   : > { %777 = dma.done.wait (!%p662_p2), %s532_s12, 1024  }
 0x20b   : > { %779 = vsyncadd (!%p662_p2), %s532_s12, 4294966272  ;;  %p15_p3 = scmp.ge.s32.totalorder %s854_s24, 4   ;;  %s1053_s18 = smov %s786_s19 }
 0x20c   : > { %s1054_s19 = smov %s790_s20  ;;  %s1055_s20 = smov %s865_s27 }
 0x20d   : > { %s1056_s21 = smov %s854_s24  ;;  %17 = sbr.rel (!%p15_p3) target bundleno = 3 (0x3), region = 75 }
 0x214   :  { %537 = vsyncpa [#allocation3], 1 }
 0x215   :  { %539 = vsyncpa [#allocation3 + $0x1], 1 }

</bundles_post_ra>
